<compile_context>
chip_gen: v5e
topology: v5e:2x2
jax: 0.10.0
libtpu: 0.0.40
codegen_flags: <defaults>
</compile_context>

<pallas_src>
import functools

import numpy as np

import jax
import jax.numpy as jnp
from jax.experimental import pallas as pl
from jax.experimental.pallas import tpu as pltpu


def _round_up(x, m):
    return (x + m - 1) // m * m


# ----------------------------------------------------------------------------
# Fused decoder kernel
# ----------------------------------------------------------------------------
def _decoder_kernel(z_ref, wfc_ref, bfc_ref, w1_ref, b1_ref, w2_ref, b2_ref,
                    o_ref, *, h1, c2, c1, c_out):
    h2, h3 = 2 * h1, 4 * h1
    tb = z_ref.shape[0]
    cw = h1 * c2          # fc lanes per spatial row i1: (j1, c2)
    yw = h2 * c1          # conv1 lanes per row-tap ki1: (j2, c1)
    zw = c_out * h3       # conv2 lanes per row-tap ki2: (oc, j3)

    # ---- t_fc + softplus ; output lanes ordered (i1, j1, c2) ---------------
    x = jnp.dot(z_ref[...], wfc_ref[...], preferred_element_type=jnp.float32)
    x = jax.nn.softplus(x + bfc_ref[...])                       # (tb, h1*cw)

    # ---- relayout: spatial row i1 -> GEMM rows (h1 chunks of tb rows) ------
    xa = jnp.concatenate(
        [x[:, i1 * cw:(i1 + 1) * cw] for i1 in range(h1)], axis=0)  # (h1*tb, cw)

    # ---- t_conv1 (both row-taps in one GEMM, column scatter in weight) -----
    y = jnp.dot(xa, w1_ref[...], preferred_element_type=jnp.float32)
    y = jax.nn.softplus(y + b1_ref[...])          # (h1*tb, 2*yw), lanes (ki1, j2, c1)
    yb = jnp.concatenate([y[:, :yw], y[:, yw:]], axis=0)   # rows (ki1, i1, b)

    # ---- t_conv2 (both row-taps in one GEMM) + sigmoid ---------------------
    zc = jnp.dot(yb, w2_ref[...], preferred_element_type=jnp.float32)
    zc = jax.nn.sigmoid(zc + b2_ref[...]).astype(o_ref.dtype)
    # zc: (2*h1*tb, 2*zw), rows (ki1, i1, b), lanes (ki2, oc, j3)

    # ---- place each row-chunk at its NCHW-flattened lane offset ------------
    for ki1 in range(2):
        for i1 in range(h1):
            ci = ki1 * h1 + i1
            blk = zc[ci * tb:(ci + 1) * tb, :]
            for ki2 in range(2):
                r3 = 4 * i1 + 2 * ki1 + ki2          # output image row
                for oc in range(c_out):
                    dst = oc * h3 * h3 + r3 * h3
                    src = ki2 * zw + oc * h3
                    o_ref[:, dst:dst + h3] = blk[:, src:src + h3]


def decoder_forward(z, consts, *, in_dim, filters1, filters2, pools,
                    block_rows=256):
    """z: (B, z_dim) -> (B, 3*in_dim*in_dim), matching the PyTorch NCHW flatten."""
    B, z_dim = z.shape
    h1 = in_dim // pools ** 2
    h3 = 4 * h1
    c2, c1, c_out = filters2, filters1, 3
    n_out = c_out * h3 * h3

    wfc, bfc = consts["w_fc"], consts["b_fc"]
    w1, b1 = consts["w1"], consts["b1"]
    w2, b2 = consts["w2"], consts["b2"]

    # Row tile minimizing padding waste (review item), sublane aligned.
    nblk = pl.cdiv(B, block_rows)
    tb = _round_up(pl.cdiv(B, nblk), 8)
    bp = nblk * tb
    zp = z.astype(jnp.float32)
    if bp != B:
        zp = jnp.pad(zp, ((0, bp - B), (0, 0)))

    kernel = functools.partial(_decoder_kernel, h1=h1, c2=c2, c1=c1, c_out=c_out)

    out = pl.pallas_call(
        kernel,
        out_shape=jax.ShapeDtypeStruct((bp, n_out), jnp.float32),
        grid=(nblk,),
        in_specs=[
            pl.BlockSpec((tb, z_dim), lambda i: (i, 0)),   # z rows (tiled)
            pl.BlockSpec(wfc.shape, lambda i: (0, 0)),     # fc weight  (resident)
            pl.BlockSpec(bfc.shape, lambda i: (0, 0)),
            pl.BlockSpec(w1.shape, lambda i: (0, 0)),      # conv1 folded weight
            pl.BlockSpec(b1.shape, lambda i: (0, 0)),
            pl.BlockSpec(w2.shape, lambda i: (0, 0)),      # conv2 folded weight
            pl.BlockSpec(b2.shape, lambda i: (0, 0)),
        ],
        out_specs=pl.BlockSpec((tb, n_out), lambda i: (i, 0)),  # lane-dense (768)
        compiler_params=pltpu.CompilerParams(
            dimension_semantics=("parallel",),
            vmem_limit_bytes=32 * 1024 * 1024,
        ),
    )(zp, wfc, bfc, w1, b1, w2, b2)
    return out[:B]


# ----------------------------------------------------------------------------
# One-time parameter preparation (outside the jit hot path)
# ----------------------------------------------------------------------------
def prepare_decoder_consts(params, *, in_dim, filters1, filters2, pools):
    h1 = in_dim // pools ** 2
    h2, h3 = 2 * h1, 4 * h1
    c2, c1, c_out = filters2, filters1, 3

    # fc: reorder output columns (c2, i1, j1) -> (i1, j1, c2)
    w_fc = np.asarray(params["w_fc"], np.float32)          # (z_dim, c2*h1*h1)
    b_fc = np.asarray(params["b_fc"], np.float32)
    z_dim = w_fc.shape[0]
    wfc_l = (w_fc.reshape(z_dim, c2, h1, h1).transpose(0, 2, 3, 1)
             .reshape(z_dim, h1 * h1 * c2))
    bfc_l = b_fc.reshape(c2, h1, h1).transpose(1, 2, 0).reshape(1, -1)

    # conv1: fold column scatter j2 = 2*j1 + kj into a block-diagonal weight.
    # rows (j1, c2), cols (ki1, j2, c1).
    w1 = np.asarray(params["w_conv1"], np.float32)         # (c2, c1, 2, 2)
    w1f = np.zeros((h1, c2, 2, h2, c1), np.float32)        # [j1, c2, ki1, j2, oc]
    for j1 in range(h1):
        for kj in range(2):
            w1f[j1, :, :, 2 * j1 + kj, :] = w1[:, :, :, kj].transpose(0, 2, 1)
    w1f = w1f.reshape(h1 * c2, 2 * h2 * c1)
    b1f = np.tile(np.asarray(params["b_conv1"], np.float32), 2 * h2).reshape(1, -1)

    # conv2: rows (j2, c1), cols (ki2, oc, j3) with j3 = 2*j2 + kj.
    w2 = np.asarray(params["w_conv2"], np.float32)          # (c1, 3, 2, 2)
    w2f = np.zeros((h2, c1, 2, c_out, h3), np.float32)      # [j2, c1, ki2, oc, j3]
    for j2 in range(h2):
        for kj in range(2):
            w2f[j2, :, :, :, 2 * j2 + kj] = w2[:, :, :, kj].transpose(0, 2, 1)
    w2f = w2f.reshape(h2 * c1, 2 * c_out * h3)
    b2f = np.tile(np.repeat(np.asarray(params["b_conv2"], np.float32), h3),
                  2).reshape(1, -1)

    return {
        "w_fc": jnp.asarray(wfc_l), "b_fc": jnp.asarray(bfc_l),
        "w1": jnp.asarray(w1f), "b1": jnp.asarray(b1f),
        "w2": jnp.asarray(w2f), "b2": jnp.asarray(b2f),
    }


# ----------------------------------------------------------------------------
# Pure-JAX reference (PyTorch semantics) for correctness checking
# ----------------------------------------------------------------------------
def decoder_reference(z, params, *, in_dim, filters1, filters2, pools):
    B = z.shape[0]
    h1 = in_dim // pools ** 2
    x = jax.nn.softplus(z @ params["w_fc"] + params["b_fc"])
    x = x.reshape(B, filters2, h1, h1)
    y = jnp.einsum("ncij,cokl->noikjl", x, params["w_conv1"]).reshape(
        B, filters1, 2 * h1, 2 * h1)
    y = jax.nn.softplus(y + params["b_conv1"][None, :, None, None])
    o = jnp.einsum("ncij,cokl->noikjl", y, params["w_conv2"]).reshape(
        B, 3, 4 * h1, 4 * h1)
    o = jax.nn.sigmoid(o + params["b_conv2"][None, :, None, None])
    return o.reshape(B, -1)


# ----------------------------------------------------------------------------
# Deterministic synthetic parameters (shapes from Decoder.__init__)
# ----------------------------------------------------------------------------
def init_params(key, z_dim, in_dim, filters1, filters2, pools):
    fc_dim = (in_dim // pools ** 2) ** 2 * filters2
    ks = jax.random.split(key, 6)
    scale = 0.1
    return {
        # stored as (z_dim, fc_dim) == W.T of PyTorch's (fc_dim, z_dim)
        "w_fc": scale * jax.random.normal(ks[0], (z_dim, fc_dim), jnp.float32),
        "b_fc": scale * jax.random.normal(ks[1], (fc_dim,), jnp.float32),
        # PyTorch ConvTranspose2d weight layout: (in_ch, out_ch, kH, kW)
        "w_conv1": scale * jax.random.normal(ks[2], (filters2, filters1, 2, 2), jnp.float32),
        "b_conv1": scale * jax.random.normal(ks[3], (filters1,), jnp.float32),
        "w_conv2": scale * jax.random.normal(ks[4], (filters1, 3, 2, 2), jnp.float32),
        "b_conv2": scale * jax.random.normal(ks[5], (3,), jnp.float32),
    }


if __name__ == "__main__":
    # Small configuration consistent with the module:
    #   in_dim=16, pools=2 -> h1=4, fc_dim=64; output = 3*16*16 = 768 lanes.
    B, Z_DIM, IN_DIM, F1, F2, POOLS = 2, 8, 16, 16, 4, 2

    key = jax.random.PRNGKey(0)
    pkey, zkey = jax.random.split(key)
    params = init_params(pkey, Z_DIM, IN_DIM, F1, F2, POOLS)
    z = jax.random.normal(zkey, (B, Z_DIM), jnp.float32)

    # One-time prep (weight folding / permutations) -- NOT in the hot path.
    consts = prepare_decoder_consts(
        params, in_dim=IN_DIM, filters1=F1, filters2=F2, pools=POOLS)

    fwd = jax.jit(functools.partial(
        decoder_forward, in_dim=IN_DIM, filters1=F1, filters2=F2, pools=POOLS))
    loc_img = fwd(z, consts)
    jax.block_until_ready(loc_img)

    # Correctness vs. pure-JAX reference with PyTorch semantics.
    ref = decoder_reference(
        z, params, in_dim=IN_DIM, filters1=F1, filters2=F2, pools=POOLS)
    ref = jax.block_until_ready(ref)

    assert loc_img.shape == (B, 3 * IN_DIM * IN_DIM), loc_img.shape
    assert bool(jnp.all(jnp.isfinite(loc_img)))
    assert bool(jnp.all((loc_img >= 0.0) & (loc_img <= 1.0)))  # sigmoid range
    assert bool(jnp.allclose(loc_img, ref, atol=1e-4, rtol=1e-4)), float(
        jnp.max(jnp.abs(loc_img - ref)))
    print("KERNEL_OK")
</pallas_src>

<mosaic_0001>
module attributes {stable_mosaic.version = 11 : i64} {
  func.func @_decoder_kernel(%arg0: i32, %arg1: memref<8x8xf32, #tpu.memory_space<vmem>>, %arg2: memref<8x64xf32, #tpu.memory_space<vmem>>, %arg3: memref<1x64xf32, #tpu.memory_space<vmem>>, %arg4: memref<16x256xf32, #tpu.memory_space<vmem>>, %arg5: memref<1x256xf32, #tpu.memory_space<vmem>>, %arg6: memref<128x96xf32, #tpu.memory_space<vmem>>, %arg7: memref<1x96xf32, #tpu.memory_space<vmem>>, %arg8: memref<8x768xf32, #tpu.memory_space<vmem>>) attributes {dimension_semantics = [#tpu.dimension_semantics<parallel>], iteration_bounds = array<i64: 1>, scalar_prefetch = 0 : i64, scratch_operands = 0 : i64, tpu.core_type = #tpu.core_type<tc>, window_params = [{transform_indices = @transform_0, window_bounds = array<i64: 8, 8>}, {pipeline_mode = #tpu.pipeline_mode<synchronous>, transform_indices = @transform_1, window_bounds = array<i64: 8, 64>}, {pipeline_mode = #tpu.pipeline_mode<synchronous>, transform_indices = @transform_2, window_bounds = array<i64: 1, 64>}, {pipeline_mode = #tpu.pipeline_mode<synchronous>, transform_indices = @transform_3, window_bounds = array<i64: 16, 256>}, {pipeline_mode = #tpu.pipeline_mode<synchronous>, transform_indices = @transform_4, window_bounds = array<i64: 1, 256>}, {pipeline_mode = #tpu.pipeline_mode<synchronous>, transform_indices = @transform_5, window_bounds = array<i64: 128, 96>}, {pipeline_mode = #tpu.pipeline_mode<synchronous>, transform_indices = @transform_6, window_bounds = array<i64: 1, 96>}, {transform_indices = @transform_7, window_bounds = array<i64: 8, 768>}]} {
    %c0 = arith.constant 0 : index
    %c0_0 = arith.constant 0 : index
    %0 = vector.load %arg1[%c0, %c0_0] : memref<8x8xf32, #tpu.memory_space<vmem>>, vector<8x8xf32>
    %c0_1 = arith.constant 0 : index
    %c0_2 = arith.constant 0 : index
    %1 = vector.load %arg2[%c0_1, %c0_2] : memref<8x64xf32, #tpu.memory_space<vmem>>, vector<8x64xf32>
    %cst = arith.constant dense<0.000000e+00> : vector<8x64xf32>
    %2 = tpu.matmul %0, %1, %cst {dimension_numbers = #tpu.dot_dimension_numbers<[1], [0], [0], [1], [0, 0, 1, 1], [], []>} : vector<8x8xf32>, vector<8x64xf32>, vector<8x64xf32> -> vector<8x64xf32>
    %c0_3 = arith.constant 0 : index
    %c0_4 = arith.constant 0 : index
    %3 = vector.load %arg3[%c0_3, %c0_4] : memref<1x64xf32, #tpu.memory_space<vmem>>, vector<1x64xf32>
    %4 = vector.broadcast %3 : vector<1x64xf32> to vector<8x64xf32>
    %5 = arith.addf %2, %4 : vector<8x64xf32>
    %cst_5 = arith.constant 0.000000e+00 : f32
    %6 = vector.broadcast %cst_5 : f32 to vector<8x64xf32>
    %7 = arith.maximumf %5, %6 : vector<8x64xf32>
    %8 = vector.broadcast %cst_5 : f32 to vector<8x64xf32>
    %9 = arith.subf %5, %8 : vector<8x64xf32>
    %10 = arith.cmpf one, %9, %9 : vector<8x64xf32>
    %11 = vector.broadcast %cst_5 : f32 to vector<8x64xf32>
    %12 = arith.addf %5, %11 : vector<8x64xf32>
    %13 = math.absf %9 : vector<8x64xf32>
    %cst_6 = arith.constant 0.000000e+00 : f32
    %14 = vector.broadcast %cst_6 : f32 to vector<8x64xf32>
    %15 = arith.subf %14, %13 : vector<8x64xf32>
    %16 = math.exp %15 : vector<8x64xf32>
    %17 = math.log1p %16 : vector<8x64xf32>
    %18 = arith.addf %7, %17 : vector<8x64xf32>
    %19 = arith.select %10, %12, %18 : vector<8x64xi1>, vector<8x64xf32>
    %20 = vector.extract_strided_slice %19 {offsets = [0, 0], sizes = [8, 16], strides = [1, 1]} : vector<8x64xf32> to vector<8x16xf32>
    %21 = vector.extract_strided_slice %19 {offsets = [0, 16], sizes = [8, 16], strides = [1, 1]} : vector<8x64xf32> to vector<8x16xf32>
    %22 = vector.extract_strided_slice %19 {offsets = [0, 32], sizes = [8, 16], strides = [1, 1]} : vector<8x64xf32> to vector<8x16xf32>
    %23 = vector.extract_strided_slice %19 {offsets = [0, 48], sizes = [8, 16], strides = [1, 1]} : vector<8x64xf32> to vector<8x16xf32>
    %24 = tpu.concatenate %20, %21, %22, %23 in 0 : vector<8x16xf32>, vector<8x16xf32>, vector<8x16xf32>, vector<8x16xf32> -> vector<32x16xf32>
    %c0_7 = arith.constant 0 : index
    %c0_8 = arith.constant 0 : index
    %25 = vector.load %arg4[%c0_7, %c0_8] : memref<16x256xf32, #tpu.memory_space<vmem>>, vector<16x256xf32>
    %cst_9 = arith.constant dense<0.000000e+00> : vector<32x256xf32>
    %26 = tpu.matmul %24, %25, %cst_9 {dimension_numbers = #tpu.dot_dimension_numbers<[1], [0], [0], [1], [0, 0, 1, 1], [], []>} : vector<32x16xf32>, vector<16x256xf32>, vector<32x256xf32> -> vector<32x256xf32>
    %c0_10 = arith.constant 0 : index
    %c0_11 = arith.constant 0 : index
    %27 = vector.load %arg5[%c0_10, %c0_11] : memref<1x256xf32, #tpu.memory_space<vmem>>, vector<1x256xf32>
    %28 = vector.broadcast %27 : vector<1x256xf32> to vector<32x256xf32>
    %29 = arith.addf %26, %28 : vector<32x256xf32>
    %cst_12 = arith.constant 0.000000e+00 : f32
    %30 = vector.broadcast %cst_12 : f32 to vector<32x256xf32>
    %31 = arith.maximumf %29, %30 : vector<32x256xf32>
    %32 = vector.broadcast %cst_12 : f32 to vector<32x256xf32>
    %33 = arith.subf %29, %32 : vector<32x256xf32>
    %34 = arith.cmpf one, %33, %33 : vector<32x256xf32>
    %35 = vector.broadcast %cst_12 : f32 to vector<32x256xf32>
    %36 = arith.addf %29, %35 : vector<32x256xf32>
    %37 = math.absf %33 : vector<32x256xf32>
    %cst_13 = arith.constant 0.000000e+00 : f32
    %38 = vector.broadcast %cst_13 : f32 to vector<32x256xf32>
    %39 = arith.subf %38, %37 : vector<32x256xf32>
    %40 = math.exp %39 : vector<32x256xf32>
    %41 = math.log1p %40 : vector<32x256xf32>
    %42 = arith.addf %31, %41 : vector<32x256xf32>
    %43 = arith.select %34, %36, %42 : vector<32x256xi1>, vector<32x256xf32>
    %44 = vector.extract_strided_slice %43 {offsets = [0, 0], sizes = [32, 128], strides = [1, 1]} : vector<32x256xf32> to vector<32x128xf32>
    %45 = vector.extract_strided_slice %43 {offsets = [0, 128], sizes = [32, 128], strides = [1, 1]} : vector<32x256xf32> to vector<32x128xf32>
    %46 = tpu.concatenate %44, %45 in 0 : vector<32x128xf32>, vector<32x128xf32> -> vector<64x128xf32>
    %c0_14 = arith.constant 0 : index
    %c0_15 = arith.constant 0 : index
    %47 = vector.load %arg6[%c0_14, %c0_15] : memref<128x96xf32, #tpu.memory_space<vmem>>, vector<128x96xf32>
    %cst_16 = arith.constant dense<0.000000e+00> : vector<64x96xf32>
    %48 = tpu.matmul %46, %47, %cst_16 {dimension_numbers = #tpu.dot_dimension_numbers<[1], [0], [0], [1], [0, 0, 1, 1], [], []>} : vector<64x128xf32>, vector<128x96xf32>, vector<64x96xf32> -> vector<64x96xf32>
    %c0_17 = arith.constant 0 : index
    %c0_18 = arith.constant 0 : index
    %49 = vector.load %arg7[%c0_17, %c0_18] : memref<1x96xf32, #tpu.memory_space<vmem>>, vector<1x96xf32>
    %50 = vector.broadcast %49 : vector<1x96xf32> to vector<64x96xf32>
    %51 = arith.addf %48, %50 : vector<64x96xf32>
    %52 = arith.negf %51 : vector<64x96xf32>
    %53 = math.exp %52 : vector<64x96xf32>
    %cst_19 = arith.constant 1.000000e+00 : f32
    %54 = vector.broadcast %cst_19 : f32 to vector<64x96xf32>
    %55 = arith.addf %54, %53 : vector<64x96xf32>
    %56 = arith.divf %54, %55 : vector<64x96xf32>
    %57 = vector.extract_strided_slice %56 {offsets = [0, 0], sizes = [8, 96], strides = [1, 1]} : vector<64x96xf32> to vector<8x96xf32>
    %58 = vector.extract_strided_slice %57 {offsets = [0, 0], sizes = [8, 16], strides = [1, 1]} : vector<8x96xf32> to vector<8x16xf32>
    %c0_20 = arith.constant 0 : index
    %c0_21 = arith.constant 0 : index
    %59 = vector.load %arg8[%c0_20, %c0_21] : memref<8x768xf32, #tpu.memory_space<vmem>>, vector<8x16xf32>
    tpu.vector_store %arg8[%c0_20, %c0_21], %58 {strides = array<i32>} : memref<8x768xf32, #tpu.memory_space<vmem>>, vector<8x16xf32>,
    %60 = vector.extract_strided_slice %57 {offsets = [0, 16], sizes = [8, 16], strides = [1, 1]} : vector<8x96xf32> to vector<8x16xf32>
    %c0_22 = arith.constant 0 : index
    %c256 = arith.constant 256 : index
    %61 = vector.load %arg8[%c0_22, %c256] : memref<8x768xf32, #tpu.memory_space<vmem>>, vector<8x16xf32>
    tpu.vector_store %arg8[%c0_22, %c256], %60 {strides = array<i32>} : memref<8x768xf32, #tpu.memory_space<vmem>>, vector<8x16xf32>,
    %62 = vector.extract_strided_slice %57 {offsets = [0, 32], sizes = [8, 16], strides = [1, 1]} : vector<8x96xf32> to vector<8x16xf32>
    %c0_23 = arith.constant 0 : index
    %c512 = arith.constant 512 : index
    %63 = vector.load %arg8[%c0_23, %c512] : memref<8x768xf32, #tpu.memory_space<vmem>>, vector<8x16xf32>
    tpu.vector_store %arg8[%c0_23, %c512], %62 {strides = array<i32>} : memref<8x768xf32, #tpu.memory_space<vmem>>, vector<8x16xf32>,
    %64 = vector.extract_strided_slice %57 {offsets = [0, 48], sizes = [8, 16], strides = [1, 1]} : vector<8x96xf32> to vector<8x16xf32>
    %c0_24 = arith.constant 0 : index
    %c16 = arith.constant 16 : index
    %65 = vector.load %arg8[%c0_24, %c16] : memref<8x768xf32, #tpu.memory_space<vmem>>, vector<8x16xf32>
    tpu.vector_store %arg8[%c0_24, %c16], %64 {strides = array<i32>} : memref<8x768xf32, #tpu.memory_space<vmem>>, vector<8x16xf32>,
    %66 = vector.extract_strided_slice %57 {offsets = [0, 64], sizes = [8, 16], strides = [1, 1]} : vector<8x96xf32> to vector<8x16xf32>
    %c0_25 = arith.constant 0 : index
    %c272 = arith.constant 272 : index
    %67 = vector.load %arg8[%c0_25, %c272] : memref<8x768xf32, #tpu.memory_space<vmem>>, vector<8x16xf32>
    tpu.vector_store %arg8[%c0_25, %c272], %66 {strides = array<i32>} : memref<8x768xf32, #tpu.memory_space<vmem>>, vector<8x16xf32>,
    %68 = vector.extract_strided_slice %57 {offsets = [0, 80], sizes = [8, 16], strides = [1, 1]} : vector<8x96xf32> to vector<8x16xf32>
    %c0_26 = arith.constant 0 : index
    %c528 = arith.constant 528 : index
    %69 = vector.load %arg8[%c0_26, %c528] : memref<8x768xf32, #tpu.memory_space<vmem>>, vector<8x16xf32>
    tpu.vector_store %arg8[%c0_26, %c528], %68 {strides = array<i32>} : memref<8x768xf32, #tpu.memory_space<vmem>>, vector<8x16xf32>,
    %70 = vector.extract_strided_slice %56 {offsets = [8, 0], sizes = [8, 96], strides = [1, 1]} : vector<64x96xf32> to vector<8x96xf32>
    %71 = vector.extract_strided_slice %70 {offsets = [0, 0], sizes = [8, 16], strides = [1, 1]} : vector<8x96xf32> to vector<8x16xf32>
    %c0_27 = arith.constant 0 : index
    %c64 = arith.constant 64 : index
    %72 = vector.load %arg8[%c0_27, %c64] : memref<8x768xf32, #tpu.memory_space<vmem>>, vector<8x16xf32>
    tpu.vector_store %arg8[%c0_27, %c64], %71 {strides = array<i32>} : memref<8x768xf32, #tpu.memory_space<vmem>>, vector<8x16xf32>,
    %73 = vector.extract_strided_slice %70 {offsets = [0, 16], sizes = [8, 16], strides = [1, 1]} : vector<8x96xf32> to vector<8x16xf32>
    %c0_28 = arith.constant 0 : index
    %c320 = arith.constant 320 : index
    %74 = vector.load %arg8[%c0_28, %c320] : memref<8x768xf32, #tpu.memory_space<vmem>>, vector<8x16xf32>
    tpu.vector_store %arg8[%c0_28, %c320], %73 {strides = array<i32>} : memref<8x768xf32, #tpu.memory_space<vmem>>, vector<8x16xf32>,
    %75 = vector.extract_strided_slice %70 {offsets = [0, 32], sizes = [8, 16], strides = [1, 1]} : vector<8x96xf32> to vector<8x16xf32>
    %c0_29 = arith.constant 0 : index
    %c576 = arith.constant 576 : index
    %76 = vector.load %arg8[%c0_29, %c576] : memref<8x768xf32, #tpu.memory_space<vmem>>, vector<8x16xf32>
    tpu.vector_store %arg8[%c0_29, %c576], %75 {strides = array<i32>} : memref<8x768xf32, #tpu.memory_space<vmem>>, vector<8x16xf32>,
    %77 = vector.extract_strided_slice %70 {offsets = [0, 48], sizes = [8, 16], strides = [1, 1]} : vector<8x96xf32> to vector<8x16xf32>
    %c0_30 = arith.constant 0 : index
    %c80 = arith.constant 80 : index
    %78 = vector.load %arg8[%c0_30, %c80] : memref<8x768xf32, #tpu.memory_space<vmem>>, vector<8x16xf32>
    tpu.vector_store %arg8[%c0_30, %c80], %77 {strides = array<i32>} : memref<8x768xf32, #tpu.memory_space<vmem>>, vector<8x16xf32>,
    %79 = vector.extract_strided_slice %70 {offsets = [0, 64], sizes = [8, 16], strides = [1, 1]} : vector<8x96xf32> to vector<8x16xf32>
    %c0_31 = arith.constant 0 : index
    %c336 = arith.constant 336 : index
    %80 = vector.load %arg8[%c0_31, %c336] : memref<8x768xf32, #tpu.memory_space<vmem>>, vector<8x16xf32>
    tpu.vector_store %arg8[%c0_31, %c336], %79 {strides = array<i32>} : memref<8x768xf32, #tpu.memory_space<vmem>>, vector<8x16xf32>,
    %81 = vector.extract_strided_slice %70 {offsets = [0, 80], sizes = [8, 16], strides = [1, 1]} : vector<8x96xf32> to vector<8x16xf32>
    %c0_32 = arith.constant 0 : index
    %c592 = arith.constant 592 : index
    %82 = vector.load %arg8[%c0_32, %c592] : memref<8x768xf32, #tpu.memory_space<vmem>>, vector<8x16xf32>
    tpu.vector_store %arg8[%c0_32, %c592], %81 {strides = array<i32>} : memref<8x768xf32, #tpu.memory_space<vmem>>, vector<8x16xf32>,
    %83 = vector.extract_strided_slice %56 {offsets = [16, 0], sizes = [8, 96], strides = [1, 1]} : vector<64x96xf32> to vector<8x96xf32>
    %84 = vector.extract_strided_slice %83 {offsets = [0, 0], sizes = [8, 16], strides = [1, 1]} : vector<8x96xf32> to vector<8x16xf32>
    %c0_33 = arith.constant 0 : index
    %c128 = arith.constant 128 : index
    %85 = vector.load %arg8[%c0_33, %c128] : memref<8x768xf32, #tpu.memory_space<vmem>>, vector<8x16xf32>
    tpu.vector_store %arg8[%c0_33, %c128], %84 {strides = array<i32>} : memref<8x768xf32, #tpu.memory_space<vmem>>, vector<8x16xf32>,
    %86 = vector.extract_strided_slice %83 {offsets = [0, 16], sizes = [8, 16], strides = [1, 1]} : vector<8x96xf32> to vector<8x16xf32>
    %c0_34 = arith.constant 0 : index
    %c384 = arith.constant 384 : index
    %87 = vector.load %arg8[%c0_34, %c384] : memref<8x768xf32, #tpu.memory_space<vmem>>, vector<8x16xf32>
    tpu.vector_store %arg8[%c0_34, %c384], %86 {strides = array<i32>} : memref<8x768xf32, #tpu.memory_space<vmem>>, vector<8x16xf32>,
    %88 = vector.extract_strided_slice %83 {offsets = [0, 32], sizes = [8, 16], strides = [1, 1]} : vector<8x96xf32> to vector<8x16xf32>
    %c0_35 = arith.constant 0 : index
    %c640 = arith.constant 640 : index
    %89 = vector.load %arg8[%c0_35, %c640] : memref<8x768xf32, #tpu.memory_space<vmem>>, vector<8x16xf32>
    tpu.vector_store %arg8[%c0_35, %c640], %88 {strides = array<i32>} : memref<8x768xf32, #tpu.memory_space<vmem>>, vector<8x16xf32>,
    %90 = vector.extract_strided_slice %83 {offsets = [0, 48], sizes = [8, 16], strides = [1, 1]} : vector<8x96xf32> to vector<8x16xf32>
    %c0_36 = arith.constant 0 : index
    %c144 = arith.constant 144 : index
    %91 = vector.load %arg8[%c0_36, %c144] : memref<8x768xf32, #tpu.memory_space<vmem>>, vector<8x16xf32>
    tpu.vector_store %arg8[%c0_36, %c144], %90 {strides = array<i32>} : memref<8x768xf32, #tpu.memory_space<vmem>>, vector<8x16xf32>,
    %92 = vector.extract_strided_slice %83 {offsets = [0, 64], sizes = [8, 16], strides = [1, 1]} : vector<8x96xf32> to vector<8x16xf32>
    %c0_37 = arith.constant 0 : index
    %c400 = arith.constant 400 : index
    %93 = vector.load %arg8[%c0_37, %c400] : memref<8x768xf32, #tpu.memory_space<vmem>>, vector<8x16xf32>
    tpu.vector_store %arg8[%c0_37, %c400], %92 {strides = array<i32>} : memref<8x768xf32, #tpu.memory_space<vmem>>, vector<8x16xf32>,
    %94 = vector.extract_strided_slice %83 {offsets = [0, 80], sizes = [8, 16], strides = [1, 1]} : vector<8x96xf32> to vector<8x16xf32>
    %c0_38 = arith.constant 0 : index
    %c656 = arith.constant 656 : index
    %95 = vector.load %arg8[%c0_38, %c656] : memref<8x768xf32, #tpu.memory_space<vmem>>, vector<8x16xf32>
    tpu.vector_store %arg8[%c0_38, %c656], %94 {strides = array<i32>} : memref<8x768xf32, #tpu.memory_space<vmem>>, vector<8x16xf32>,
    %96 = vector.extract_strided_slice %56 {offsets = [24, 0], sizes = [8, 96], strides = [1, 1]} : vector<64x96xf32> to vector<8x96xf32>
    %97 = vector.extract_strided_slice %96 {offsets = [0, 0], sizes = [8, 16], strides = [1, 1]} : vector<8x96xf32> to vector<8x16xf32>
    %c0_39 = arith.constant 0 : index
    %c192 = arith.constant 192 : index
    %98 = vector.load %arg8[%c0_39, %c192] : memref<8x768xf32, #tpu.memory_space<vmem>>, vector<8x16xf32>
    tpu.vector_store %arg8[%c0_39, %c192], %97 {strides = array<i32>} : memref<8x768xf32, #tpu.memory_space<vmem>>, vector<8x16xf32>,
    %99 = vector.extract_strided_slice %96 {offsets = [0, 16], sizes = [8, 16], strides = [1, 1]} : vector<8x96xf32> to vector<8x16xf32>
    %c0_40 = arith.constant 0 : index
    %c448 = arith.constant 448 : index
    %100 = vector.load %arg8[%c0_40, %c448] : memref<8x768xf32, #tpu.memory_space<vmem>>, vector<8x16xf32>
    tpu.vector_store %arg8[%c0_40, %c448], %99 {strides = array<i32>} : memref<8x768xf32, #tpu.memory_space<vmem>>, vector<8x16xf32>,
    %101 = vector.extract_strided_slice %96 {offsets = [0, 32], sizes = [8, 16], strides = [1, 1]} : vector<8x96xf32> to vector<8x16xf32>
    %c0_41 = arith.constant 0 : index
    %c704 = arith.constant 704 : index
    %102 = vector.load %arg8[%c0_41, %c704] : memref<8x768xf32, #tpu.memory_space<vmem>>, vector<8x16xf32>
    tpu.vector_store %arg8[%c0_41, %c704], %101 {strides = array<i32>} : memref<8x768xf32, #tpu.memory_space<vmem>>, vector<8x16xf32>,
    %103 = vector.extract_strided_slice %96 {offsets = [0, 48], sizes = [8, 16], strides = [1, 1]} : vector<8x96xf32> to vector<8x16xf32>
    %c0_42 = arith.constant 0 : index
    %c208 = arith.constant 208 : index
    %104 = vector.load %arg8[%c0_42, %c208] : memref<8x768xf32, #tpu.memory_space<vmem>>, vector<8x16xf32>
    tpu.vector_store %arg8[%c0_42, %c208], %103 {strides = array<i32>} : memref<8x768xf32, #tpu.memory_space<vmem>>, vector<8x16xf32>,
    %105 = vector.extract_strided_slice %96 {offsets = [0, 64], sizes = [8, 16], strides = [1, 1]} : vector<8x96xf32> to vector<8x16xf32>
    %c0_43 = arith.constant 0 : index
    %c464 = arith.constant 464 : index
    %106 = vector.load %arg8[%c0_43, %c464] : memref<8x768xf32, #tpu.memory_space<vmem>>, vector<8x16xf32>
    tpu.vector_store %arg8[%c0_43, %c464], %105 {strides = array<i32>} : memref<8x768xf32, #tpu.memory_space<vmem>>, vector<8x16xf32>,
    %107 = vector.extract_strided_slice %96 {offsets = [0, 80], sizes = [8, 16], strides = [1, 1]} : vector<8x96xf32> to vector<8x16xf32>
    %c0_44 = arith.constant 0 : index
    %c720 = arith.constant 720 : index
    %108 = vector.load %arg8[%c0_44, %c720] : memref<8x768xf32, #tpu.memory_space<vmem>>, vector<8x16xf32>
    tpu.vector_store %arg8[%c0_44, %c720], %107 {strides = array<i32>} : memref<8x768xf32, #tpu.memory_space<vmem>>, vector<8x16xf32>,
    %109 = vector.extract_strided_slice %56 {offsets = [32, 0], sizes = [8, 96], strides = [1, 1]} : vector<64x96xf32> to vector<8x96xf32>
    %110 = vector.extract_strided_slice %109 {offsets = [0, 0], sizes = [8, 16], strides = [1, 1]} : vector<8x96xf32> to vector<8x16xf32>
    %c0_45 = arith.constant 0 : index
    %c32 = arith.constant 32 : index
    %111 = vector.load %arg8[%c0_45, %c32] : memref<8x768xf32, #tpu.memory_space<vmem>>, vector<8x16xf32>
    tpu.vector_store %arg8[%c0_45, %c32], %110 {strides = array<i32>} : memref<8x768xf32, #tpu.memory_space<vmem>>, vector<8x16xf32>,
    %112 = vector.extract_strided_slice %109 {offsets = [0, 16], sizes = [8, 16], strides = [1, 1]} : vector<8x96xf32> to vector<8x16xf32>
    %c0_46 = arith.constant 0 : index
    %c288 = arith.constant 288 : index
    %113 = vector.load %arg8[%c0_46, %c288] : memref<8x768xf32, #tpu.memory_space<vmem>>, vector<8x16xf32>
    tpu.vector_store %arg8[%c0_46, %c288], %112 {strides = array<i32>} : memref<8x768xf32, #tpu.memory_space<vmem>>, vector<8x16xf32>,
    %114 = vector.extract_strided_slice %109 {offsets = [0, 32], sizes = [8, 16], strides = [1, 1]} : vector<8x96xf32> to vector<8x16xf32>
    %c0_47 = arith.constant 0 : index
    %c544 = arith.constant 544 : index
    %115 = vector.load %arg8[%c0_47, %c544] : memref<8x768xf32, #tpu.memory_space<vmem>>, vector<8x16xf32>
    tpu.vector_store %arg8[%c0_47, %c544], %114 {strides = array<i32>} : memref<8x768xf32, #tpu.memory_space<vmem>>, vector<8x16xf32>,
    %116 = vector.extract_strided_slice %109 {offsets = [0, 48], sizes = [8, 16], strides = [1, 1]} : vector<8x96xf32> to vector<8x16xf32>
    %c0_48 = arith.constant 0 : index
    %c48 = arith.constant 48 : index
    %117 = vector.load %arg8[%c0_48, %c48] : memref<8x768xf32, #tpu.memory_space<vmem>>, vector<8x16xf32>
    tpu.vector_store %arg8[%c0_48, %c48], %116 {strides = array<i32>} : memref<8x768xf32, #tpu.memory_space<vmem>>, vector<8x16xf32>,
    %118 = vector.extract_strided_slice %109 {offsets = [0, 64], sizes = [8, 16], strides = [1, 1]} : vector<8x96xf32> to vector<8x16xf32>
    %c0_49 = arith.constant 0 : index
    %c304 = arith.constant 304 : index
    %119 = vector.load %arg8[%c0_49, %c304] : memref<8x768xf32, #tpu.memory_space<vmem>>, vector<8x16xf32>
    tpu.vector_store %arg8[%c0_49, %c304], %118 {strides = array<i32>} : memref<8x768xf32, #tpu.memory_space<vmem>>, vector<8x16xf32>,
    %120 = vector.extract_strided_slice %109 {offsets = [0, 80], sizes = [8, 16], strides = [1, 1]} : vector<8x96xf32> to vector<8x16xf32>
    %c0_50 = arith.constant 0 : index
    %c560 = arith.constant 560 : index
    %121 = vector.load %arg8[%c0_50, %c560] : memref<8x768xf32, #tpu.memory_space<vmem>>, vector<8x16xf32>
    tpu.vector_store %arg8[%c0_50, %c560], %120 {strides = array<i32>} : memref<8x768xf32, #tpu.memory_space<vmem>>, vector<8x16xf32>,
    %122 = vector.extract_strided_slice %56 {offsets = [40, 0], sizes = [8, 96], strides = [1, 1]} : vector<64x96xf32> to vector<8x96xf32>
    %123 = vector.extract_strided_slice %122 {offsets = [0, 0], sizes = [8, 16], strides = [1, 1]} : vector<8x96xf32> to vector<8x16xf32>
    %c0_51 = arith.constant 0 : index
    %c96 = arith.constant 96 : index
    %124 = vector.load %arg8[%c0_51, %c96] : memref<8x768xf32, #tpu.memory_space<vmem>>, vector<8x16xf32>
    tpu.vector_store %arg8[%c0_51, %c96], %123 {strides = array<i32>} : memref<8x768xf32, #tpu.memory_space<vmem>>, vector<8x16xf32>,
    %125 = vector.extract_strided_slice %122 {offsets = [0, 16], sizes = [8, 16], strides = [1, 1]} : vector<8x96xf32> to vector<8x16xf32>
    %c0_52 = arith.constant 0 : index
    %c352 = arith.constant 352 : index
    %126 = vector.load %arg8[%c0_52, %c352] : memref<8x768xf32, #tpu.memory_space<vmem>>, vector<8x16xf32>
    tpu.vector_store %arg8[%c0_52, %c352], %125 {strides = array<i32>} : memref<8x768xf32, #tpu.memory_space<vmem>>, vector<8x16xf32>,
    %127 = vector.extract_strided_slice %122 {offsets = [0, 32], sizes = [8, 16], strides = [1, 1]} : vector<8x96xf32> to vector<8x16xf32>
    %c0_53 = arith.constant 0 : index
    %c608 = arith.constant 608 : index
    %128 = vector.load %arg8[%c0_53, %c608] : memref<8x768xf32, #tpu.memory_space<vmem>>, vector<8x16xf32>
    tpu.vector_store %arg8[%c0_53, %c608], %127 {strides = array<i32>} : memref<8x768xf32, #tpu.memory_space<vmem>>, vector<8x16xf32>,
    %129 = vector.extract_strided_slice %122 {offsets = [0, 48], sizes = [8, 16], strides = [1, 1]} : vector<8x96xf32> to vector<8x16xf32>
    %c0_54 = arith.constant 0 : index
    %c112 = arith.constant 112 : index
    %130 = vector.load %arg8[%c0_54, %c112] : memref<8x768xf32, #tpu.memory_space<vmem>>, vector<8x16xf32>
    tpu.vector_store %arg8[%c0_54, %c112], %129 {strides = array<i32>} : memref<8x768xf32, #tpu.memory_space<vmem>>, vector<8x16xf32>,
    %131 = vector.extract_strided_slice %122 {offsets = [0, 64], sizes = [8, 16], strides = [1, 1]} : vector<8x96xf32> to vector<8x16xf32>
    %c0_55 = arith.constant 0 : index
    %c368 = arith.constant 368 : index
    %132 = vector.load %arg8[%c0_55, %c368] : memref<8x768xf32, #tpu.memory_space<vmem>>, vector<8x16xf32>
    tpu.vector_store %arg8[%c0_55, %c368], %131 {strides = array<i32>} : memref<8x768xf32, #tpu.memory_space<vmem>>, vector<8x16xf32>,
    %133 = vector.extract_strided_slice %122 {offsets = [0, 80], sizes = [8, 16], strides = [1, 1]} : vector<8x96xf32> to vector<8x16xf32>
    %c0_56 = arith.constant 0 : index
    %c624 = arith.constant 624 : index
    %134 = vector.load %arg8[%c0_56, %c624] : memref<8x768xf32, #tpu.memory_space<vmem>>, vector<8x16xf32>
    tpu.vector_store %arg8[%c0_56, %c624], %133 {strides = array<i32>} : memref<8x768xf32, #tpu.memory_space<vmem>>, vector<8x16xf32>,
    %135 = vector.extract_strided_slice %56 {offsets = [48, 0], sizes = [8, 96], strides = [1, 1]} : vector<64x96xf32> to vector<8x96xf32>
    %136 = vector.extract_strided_slice %135 {offsets = [0, 0], sizes = [8, 16], strides = [1, 1]} : vector<8x96xf32> to vector<8x16xf32>
    %c0_57 = arith.constant 0 : index
    %c160 = arith.constant 160 : index
    %137 = vector.load %arg8[%c0_57, %c160] : memref<8x768xf32, #tpu.memory_space<vmem>>, vector<8x16xf32>
    tpu.vector_store %arg8[%c0_57, %c160], %136 {strides = array<i32>} : memref<8x768xf32, #tpu.memory_space<vmem>>, vector<8x16xf32>,
    %138 = vector.extract_strided_slice %135 {offsets = [0, 16], sizes = [8, 16], strides = [1, 1]} : vector<8x96xf32> to vector<8x16xf32>
    %c0_58 = arith.constant 0 : index
    %c416 = arith.constant 416 : index
    %139 = vector.load %arg8[%c0_58, %c416] : memref<8x768xf32, #tpu.memory_space<vmem>>, vector<8x16xf32>
    tpu.vector_store %arg8[%c0_58, %c416], %138 {strides = array<i32>} : memref<8x768xf32, #tpu.memory_space<vmem>>, vector<8x16xf32>,
    %140 = vector.extract_strided_slice %135 {offsets = [0, 32], sizes = [8, 16], strides = [1, 1]} : vector<8x96xf32> to vector<8x16xf32>
    %c0_59 = arith.constant 0 : index
    %c672 = arith.constant 672 : index
    %141 = vector.load %arg8[%c0_59, %c672] : memref<8x768xf32, #tpu.memory_space<vmem>>, vector<8x16xf32>
    tpu.vector_store %arg8[%c0_59, %c672], %140 {strides = array<i32>} : memref<8x768xf32, #tpu.memory_space<vmem>>, vector<8x16xf32>,
    %142 = vector.extract_strided_slice %135 {offsets = [0, 48], sizes = [8, 16], strides = [1, 1]} : vector<8x96xf32> to vector<8x16xf32>
    %c0_60 = arith.constant 0 : index
    %c176 = arith.constant 176 : index
    %143 = vector.load %arg8[%c0_60, %c176] : memref<8x768xf32, #tpu.memory_space<vmem>>, vector<8x16xf32>
    tpu.vector_store %arg8[%c0_60, %c176], %142 {strides = array<i32>} : memref<8x768xf32, #tpu.memory_space<vmem>>, vector<8x16xf32>,
    %144 = vector.extract_strided_slice %135 {offsets = [0, 64], sizes = [8, 16], strides = [1, 1]} : vector<8x96xf32> to vector<8x16xf32>
    %c0_61 = arith.constant 0 : index
    %c432 = arith.constant 432 : index
    %145 = vector.load %arg8[%c0_61, %c432] : memref<8x768xf32, #tpu.memory_space<vmem>>, vector<8x16xf32>
    tpu.vector_store %arg8[%c0_61, %c432], %144 {strides = array<i32>} : memref<8x768xf32, #tpu.memory_space<vmem>>, vector<8x16xf32>,
    %146 = vector.extract_strided_slice %135 {offsets = [0, 80], sizes = [8, 16], strides = [1, 1]} : vector<8x96xf32> to vector<8x16xf32>
    %c0_62 = arith.constant 0 : index
    %c688 = arith.constant 688 : index
    %147 = vector.load %arg8[%c0_62, %c688] : memref<8x768xf32, #tpu.memory_space<vmem>>, vector<8x16xf32>
    tpu.vector_store %arg8[%c0_62, %c688], %146 {strides = array<i32>} : memref<8x768xf32, #tpu.memory_space<vmem>>, vector<8x16xf32>,
    %148 = vector.extract_strided_slice %56 {offsets = [56, 0], sizes = [8, 96], strides = [1, 1]} : vector<64x96xf32> to vector<8x96xf32>
    %149 = vector.extract_strided_slice %148 {offsets = [0, 0], sizes = [8, 16], strides = [1, 1]} : vector<8x96xf32> to vector<8x16xf32>
    %c0_63 = arith.constant 0 : index
    %c224 = arith.constant 224 : index
    %150 = vector.load %arg8[%c0_63, %c224] : memref<8x768xf32, #tpu.memory_space<vmem>>, vector<8x16xf32>
    tpu.vector_store %arg8[%c0_63, %c224], %149 {strides = array<i32>} : memref<8x768xf32, #tpu.memory_space<vmem>>, vector<8x16xf32>,
    %151 = vector.extract_strided_slice %148 {offsets = [0, 16], sizes = [8, 16], strides = [1, 1]} : vector<8x96xf32> to vector<8x16xf32>
    %c0_64 = arith.constant 0 : index
    %c480 = arith.constant 480 : index
    %152 = vector.load %arg8[%c0_64, %c480] : memref<8x768xf32, #tpu.memory_space<vmem>>, vector<8x16xf32>
    tpu.vector_store %arg8[%c0_64, %c480], %151 {strides = array<i32>} : memref<8x768xf32, #tpu.memory_space<vmem>>, vector<8x16xf32>,
    %153 = vector.extract_strided_slice %148 {offsets = [0, 32], sizes = [8, 16], strides = [1, 1]} : vector<8x96xf32> to vector<8x16xf32>
    %c0_65 = arith.constant 0 : index
    %c736 = arith.constant 736 : index
    %154 = vector.load %arg8[%c0_65, %c736] : memref<8x768xf32, #tpu.memory_space<vmem>>, vector<8x16xf32>
    tpu.vector_store %arg8[%c0_65, %c736], %153 {strides = array<i32>} : memref<8x768xf32, #tpu.memory_space<vmem>>, vector<8x16xf32>,
    %155 = vector.extract_strided_slice %148 {offsets = [0, 48], sizes = [8, 16], strides = [1, 1]} : vector<8x96xf32> to vector<8x16xf32>
    %c0_66 = arith.constant 0 : index
    %c240 = arith.constant 240 : index
    %156 = vector.load %arg8[%c0_66, %c240] : memref<8x768xf32, #tpu.memory_space<vmem>>, vector<8x16xf32>
    tpu.vector_store %arg8[%c0_66, %c240], %155 {strides = array<i32>} : memref<8x768xf32, #tpu.memory_space<vmem>>, vector<8x16xf32>,
    %157 = vector.extract_strided_slice %148 {offsets = [0, 64], sizes = [8, 16], strides = [1, 1]} : vector<8x96xf32> to vector<8x16xf32>
    %c0_67 = arith.constant 0 : index
    %c496 = arith.constant 496 : index
    %158 = vector.load %arg8[%c0_67, %c496] : memref<8x768xf32, #tpu.memory_space<vmem>>, vector<8x16xf32>
    tpu.vector_store %arg8[%c0_67, %c496], %157 {strides = array<i32>} : memref<8x768xf32, #tpu.memory_space<vmem>>, vector<8x16xf32>,
    %159 = vector.extract_strided_slice %148 {offsets = [0, 80], sizes = [8, 16], strides = [1, 1]} : vector<8x96xf32> to vector<8x16xf32>
    %c0_68 = arith.constant 0 : index
    %c752 = arith.constant 752 : index
    %160 = vector.load %arg8[%c0_68, %c752] : memref<8x768xf32, #tpu.memory_space<vmem>>, vector<8x16xf32>
    tpu.vector_store %arg8[%c0_68, %c752], %159 {strides = array<i32>} : memref<8x768xf32, #tpu.memory_space<vmem>>, vector<8x16xf32>,
    return
  }
  func.func @transform_0(%arg0: i32) -> (i32, i32) {
    %c0_i32 = arith.constant 0 : i32
    %c0_i32_0 = arith.constant 0 : i32
    return %arg0, %c0_i32 : i32, i32
  }
  func.func @transform_1(%arg0: i32) -> (i32, i32) {
    %c0_i32 = arith.constant 0 : i32
    %c0_i32_0 = arith.constant 0 : i32
    %c0_i32_1 = arith.constant 0 : i32
    return %c0_i32, %c0_i32_0 : i32, i32
  }
  func.func @transform_2(%arg0: i32) -> (i32, i32) {
    %c0_i32 = arith.constant 0 : i32
    %c0_i32_0 = arith.constant 0 : i32
    %c0_i32_1 = arith.constant 0 : i32
    return %c0_i32, %c0_i32_0 : i32, i32
  }
  func.func @transform_3(%arg0: i32) -> (i32, i32) {
    %c0_i32 = arith.constant 0 : i32
    %c0_i32_0 = arith.constant 0 : i32
    %c0_i32_1 = arith.constant 0 : i32
    return %c0_i32, %c0_i32_0 : i32, i32
  }
  func.func @transform_4(%arg0: i32) -> (i32, i32) {
    %c0_i32 = arith.constant 0 : i32
    %c0_i32_0 = arith.constant 0 : i32
    %c0_i32_1 = arith.constant 0 : i32
    return %c0_i32, %c0_i32_0 : i32, i32
  }
  func.func @transform_5(%arg0: i32) -> (i32, i32) {
    %c0_i32 = arith.constant 0 : i32
    %c0_i32_0 = arith.constant 0 : i32
    %c0_i32_1 = arith.constant 0 : i32
    return %c0_i32, %c0_i32_0 : i32, i32
  }
  func.func @transform_6(%arg0: i32) -> (i32, i32) {
    %c0_i32 = arith.constant 0 : i32
    %c0_i32_0 = arith.constant 0 : i32
    %c0_i32_1 = arith.constant 0 : i32
    return %c0_i32, %c0_i32_0 : i32, i32
  }
  func.func @transform_7(%arg0: i32) -> (i32, i32) {
    %c0_i32 = arith.constant 0 : i32
    %c0_i32_0 = arith.constant 0 : i32
    return %arg0, %c0_i32 : i32, i32
  }
}

</mosaic_0001>

<bundles_post_ra>
// kernel: decoder_forward.1
= control target key start
LH: loop header
LB: loop body
LE: loop exit
PB: predicated region body
PF: predicated region fallthrough
CT: control target
= control target key end

     0   :  { %vm32_vm0 = vcmask 64512   ;;  %vm91_vm3 = vcmask 130048   ;;  %s828_s13 = smov 96   ;;  %s830_s30 = smov 32   ;;  %s1318_s1 = inlined_call_operand.vmem [shape: f32[8,64], index: 1, kind: input, shape index: {}]   ;;  %s1319_s0 = inlined_call_operand.vmem [shape: f32[8,8], index: 0, kind: input, shape index: {}]   ;;  %s1320_s2 = inlined_call_operand.vmem [shape: f32[1,64], index: 2, kind: input, shape index: {}]   ;;  %s1321_s3 = inlined_call_operand.vmem [shape: f32[16,256], index: 3, kind: input, shape index: {}]   ;;  %s1322_s5 = inlined_call_operand.vmem [shape: f32[128,96], index: 5, kind: input, shape index: {}]   ;;  %s1323_s4 = inlined_call_operand.vmem [shape: f32[1,256], index: 4, kind: input, shape index: {}]   ;;  %s1324_s6 = inlined_call_operand.vmem [shape: f32[1,96], index: 6, kind: input, shape index: {}]   ;;  %s1325_s7 = inlined_call_operand.vmem [shape: f32[8,768], index: 7, kind: output, shape index: {}]  }
   0x1   :  { %v27_v0 = vld [vmem:[%s1318_s1] sm:$0xff]  ;;  %v83_v2 = vld [vmem:[%s1321_s3 + $0x10] sm:$0xff]  ;;  %v84_v3 = vld [vmem:[%s1321_s3 + $0x18] sm:$0xff]  ;;  %s831_s8 = smov 48   ;;  %s832_s16 = smov 16  }
   0x2   :  { %v26_v1 = vld [vmem:[%s1319_s0] sm:$0xff]  ;;  %51 = vmatpush.msra.mxu0 %v27_v0  ;;  %114 = vmatpush.msra.mxu1 %v83_v2  ;;  %v82_v5 = vld [vmem:[%s1321_s3 + $0x8] sm:$0xff]  ;;  %v317_v24 = vld [vmem:[%s1322_s5 + $0x78] sm:$0xff] }
   0x3   :  { %684 = vmatmul.msk.f32.vlgmr.msra.gmra.mxu0 %vm32_vm0, %v26_v1  ;;  %v81_v4 = vld [vmem:[%s1321_s3] sm:$0xff]  ;;  %143 = vmatpush.msra.mxu2 %v84_v3  ;;  %s827_s3 = smov 112   ;;  %v316_v25 = vld [vmem:[%s1322_s5 + $0x70] sm:$0xff]  ;;  %v315_v26 = vld [vmem:[%s1322_s5 + $0x68] sm:$0xff] }
   0x4   :  { %115 = vmatpush.msra.mxu1 %v81_v4  ;;  %v756_v6 = vld [vmem:[%s1320_s2] ss:$0 sm:$0xff]  ;;  %s826_s2 = smov 80   ;;  %322 = vmatpush.msrb.mxu0 %v317_v24  ;;  %v313_v28 = vld [vmem:[%s1322_s5 + $0x58] sm:$0xff]  ;;  %v312_v29 = vld [vmem:[%s1322_s5 + $0x50] sm:$0xff] }
   0x5   :  { %144 = vmatpush.msra.mxu2 %v82_v5  ;;  %703 = vmatpush.msra.mxu3 %v317_v24  ;;  %v314_v27 = vld [vmem:[%s1322_s5 + $0x60] sm:$0xff]  ;;  %v311_v30 = vld [vmem:[%s1322_s5 + $0x48] sm:$0xff]  ;;  %v309_v32 = vld [vmem:[%s1322_s5 + $0x38] sm:$0xff] }
   0x6   :  { %701 = vmatpush.msrb.mxu1 %v317_v24  ;;  %323 = vmatpush.msrb.mxu0 %v316_v25  ;;  %v310_v31 = vld [vmem:[%s1322_s5 + $0x40] sm:$0xff]  ;;  %v308_v33 = vld [vmem:[%s1322_s5 + $0x30] sm:$0xff]  ;;  %v307_v34 = vld [vmem:[%s1322_s5 + $0x28] sm:$0xff] }
   0x7   :  { %702 = vmatpush.msrb.mxu2 %v317_v24  ;;  %706 = vmatpush.msra.mxu3 %v316_v25  ;;  %v306_v35 = vld [vmem:[%s1322_s5 + $0x20] sm:$0xff]  ;;  %v305_v37 = vld [vmem:[%s1322_s5 + $0x18] sm:$0xff]  ;;  %v304_v38 = vld [vmem:[%s1322_s5 + $0x10] sm:$0xff] }
   0x8   :  { %704 = vmatpush.msrb.mxu1 %v316_v25  ;;  %324 = vmatpush.msrb.mxu0 %v315_v26  ;;  %v303_v39 = vld [vmem:[%s1322_s5 + $0x8] sm:$0xff]  ;;  %v85_v40 = vld [vmem:[%s1323_s4] sm:$0x3] }
   0x9   :  { %705 = vmatpush.msrb.mxu2 %v316_v25  ;;  %709 = vmatpush.msra.mxu3 %v315_v26  ;;  %v302_v41 = vld [vmem:[%s1322_s5] sm:$0xff]  ;;  %v954_v43 = vperm.slane %v85_v40, 0  ;;  %v88_v62 = vperm.slane %v85_v40, 1 }
   0xa   :  { %707 = vmatpush.msrb.mxu1 %v315_v26  ;;  %325 = vmatpush.msrb.mxu0 %v314_v27 }
   0xb   :  { %708 = vmatpush.msrb.mxu2 %v315_v26  ;;  %712 = vmatpush.msra.mxu3 %v314_v27 }
   0xc   :  { %710 = vmatpush.msrb.mxu1 %v314_v27  ;;  %326 = vmatpush.msrb.mxu0 %v313_v28 }
   0xd   :  { %711 = vmatpush.msrb.mxu2 %v314_v27  ;;  %715 = vmatpush.msra.mxu3 %v313_v28 }
   0xe   :  { %713 = vmatpush.msrb.mxu1 %v313_v28  ;;  %327 = vmatpush.msrb.mxu0 %v312_v29 }
   0xf   :  { %714 = vmatpush.msrb.mxu2 %v313_v28  ;;  %718 = vmatpush.msra.mxu3 %v312_v29 }
  0x10   :  { %716 = vmatpush.msrb.mxu1 %v312_v29  ;;  %328 = vmatpush.msrb.mxu0 %v311_v30 }
  0x11   :  { %717 = vmatpush.msrb.mxu2 %v312_v29  ;;  %721 = vmatpush.msra.mxu3 %v311_v30 }
  0x12   :  { %719 = vmatpush.msrb.mxu1 %v311_v30  ;;  %329 = vmatpush.msrb.mxu0 %v310_v31 }
  0x13   :  { %720 = vmatpush.msrb.mxu2 %v311_v30  ;;  %724 = vmatpush.msra.mxu3 %v310_v31 }
  0x14   :  { %722 = vmatpush.msrb.mxu1 %v310_v31  ;;  %330 = vmatpush.msrb.mxu0 %v309_v32 }
  0x15   :  { %723 = vmatpush.msrb.mxu2 %v310_v31  ;;  %727 = vmatpush.msra.mxu3 %v309_v32 }
  0x16   :  { %725 = vmatpush.msrb.mxu1 %v309_v32  ;;  %331 = vmatpush.msrb.mxu0 %v308_v33 }
  0x17   :  { %726 = vmatpush.msrb.mxu2 %v309_v32  ;;  %730 = vmatpush.msra.mxu3 %v308_v33 }
  0x18   :  { %728 = vmatpush.msrb.mxu1 %v308_v33  ;;  %332 = vmatpush.msrb.mxu0 %v307_v34 }
  0x19   :  { %729 = vmatpush.msrb.mxu2 %v308_v33  ;;  %733 = vmatpush.msra.mxu3 %v307_v34 }
  0x1a   :  { %333 = vmatpush.msrb.mxu0 %v306_v35  ;;  %731 = vmatpush.msrb.mxu1 %v307_v34 }
  0x1b   :  { %736 = vmatpush.msra.mxu3 %v306_v35  ;;  %732 = vmatpush.msrb.mxu2 %v307_v34 }
  0x1c   :  { %334 = vmatpush.msrb.mxu0 %v305_v37  ;;  %734 = vmatpush.msrb.mxu1 %v306_v35 }
  0x1d   :  { %739 = vmatpush.msra.mxu3 %v305_v37  ;;  %735 = vmatpush.msrb.mxu2 %v306_v35 }
  0x1e   :  { %335 = vmatpush.msrb.mxu0 %v304_v38  ;;  %737 = vmatpush.msrb.mxu1 %v305_v37 }
  0x1f   :  { %742 = vmatpush.msra.mxu3 %v304_v38  ;;  %738 = vmatpush.msrb.mxu2 %v305_v37 }
  0x20   :  { %336 = vmatpush.msrb.mxu0 %v303_v39  ;;  %740 = vmatpush.msrb.mxu1 %v304_v38 }
  0x21   :  { %745 = vmatpush.msra.mxu3 %v303_v39  ;;  %741 = vmatpush.msrb.mxu2 %v304_v38 }
  0x22   :  { %337 = vmatpush.msrb.mxu0 %v302_v41  ;;  %743 = vmatpush.msrb.mxu1 %v303_v39 }
  0x23   :  { %748 = vmatpush.msra.mxu3 %v302_v41  ;;  %744 = vmatpush.msrb.mxu2 %v303_v39 }
  0x24   :  { %746 = vmatpush.msrb.mxu1 %v302_v41 }
  0x25   :  { %747 = vmatpush.msrb.mxu2 %v302_v41 }
  0x80   :  { %v53_v7 = vpop.f32.mrf.mxu0 }
  0x81   :  { %v54_v8 = vadd.f32 %v756_v6, %v53_v7 }
  0x83   :  { %v59_v9 = vand.u32 2147483647, %v54_v8  ;;  %v56_v20 = vmax.f32 %v54_v8, 0.0  ;;  %vm57_vm2 = vcmp.ne.f32.partialorder %v54_v8, %v54_v8 }
  0x85   :  { %v60_v10 = vsub.f32 0.0, %v59_v9 }
  0x87   :  { %v61_v11 = vmul.f32 1.442695, %v60_v10 }
  0x89   :  { %758 = vpow2.f32 %v61_v11 }
  0x8f   :  { %v759_v12 = vpop.eup %758 }
  0x90   :  { %v63_v13 = vadd.f32 1.0, %v759_v12  ;;  %v66_v14 = vmul.f32 -0.5, %v759_v12  ;;  %v69_v16 = vand.u32 2147483647, %v759_v12 }
  0x92   :  { %760 = vlog2.f32 %v63_v13  ;;  %v67_v15 = vadd.f32 1.0, %v66_v14  ;;  %vm70_vm1 = vcmp.lt.f32.partialorder %v69_v16, 0.0004427343 }
  0x94   :  { %v68_v19 = vmul.f32 %v759_v12, %v67_v15 }
  0x98   :  { %v761_v17 = vpop.eup %760 }
  0x99   :  { %v65_v18 = vmul.f32 0.6931472, %v761_v17 }
  0x9b   :  { %v71_v21 = vsel %vm70_vm1, %v68_v19, %v65_v18 }
  0x9c   :  { %v72_v22 = vadd.f32 %v71_v21, %v56_v20 }
  0x9e   :  { %v73_v23 = vsel %vm57_vm2, %v54_v8, %v72_v22 }
  0x9f   :  { %79 = vrot.lane.b32.xlu1 %v73_v23, %s826_s2  ;;  %75 = vrot.lane.b32.xlu0 %v73_v23, %s827_s3 }
  0xa0   :  { %685 = vmatmul.msk.f32.vlgmr.msra.gmra.mxu1 %vm91_vm3, %v73_v23  ;;  %689 = vmatmul.msk.f32.vlgmr.msra.gmra.mxu2 %vm91_vm3, %v73_v23 }
  0xa7   :  { %77 = vrot.lane.b32.xlu0 %v73_v23, %s828_s13 }
 0x111   :  { %v76_v36 = vpop.permute.xlu0 %75  ;;  %v80_v47 = vpop.permute.xlu1 %79 }
 0x112   :  { %686 = vmatmul.msk.f32.gmra.mxu1 %vm91_vm3, %v76_v36  ;;  %690 = vmatmul.msk.f32.gmra.mxu2 %vm91_vm3, %v76_v36 }
 0x119   :  { %v78_v42 = vpop.permute.xlu0 %77 }
 0x11a   :  { %687 = vmatmul.msk.f32.gmra.mxu1 %vm91_vm3, %v78_v42  ;;  %691 = vmatmul.msk.f32.gmra.mxu2 %vm91_vm3, %v78_v42 }
 0x11d   :  { %v117_v44 = vpop.f32.mrf.mxu1 }
 0x11e   :  { %v118_v45 = vadd.f32 %v117_v44, %v954_v43 }
 0x120   :  { %v182_v46 = vand.u32 2147483647, %v118_v45  ;;  %v158_v58 = vmax.f32 %v118_v45, 0.0  ;;  %vm166_vm5 = vcmp.ne.f32.partialorder %v118_v45, %v118_v45 }
 0x122   :  { %v190_v48 = vsub.f32 0.0, %v182_v46  ;;  %688 = vmatmul.msk.f32.gmra.mxu1 %vm91_vm3, %v80_v47  ;;  %692 = vmatmul.msk.f32.gmra.mxu2 %vm91_vm3, %v80_v47 }
 0x123   :  { %v146_v63 = vpop.f32.mrf.mxu2 }
 0x124   :  { %v198_v49 = vmul.f32 1.442695, %v190_v48  ;;  %v959_v0 = vadd.f32 %v146_v63, %v88_v62 }
 0x126   :  { %762 = vpow2.f32 %v198_v49  ;;  %v183_v4 = vand.u32 2147483647, %v959_v0 }
 0x128   :  { %v191_v9 = vsub.f32 0.0, %v183_v4 }
 0x12a   :  { %v200_v15 = vmul.f32 1.442695, %v191_v9 }
 0x12c   :  { %v763_v50 = vpop.eup %762 }
 0x12d   :  { %v214_v51 = vadd.f32 1.0, %v763_v50  ;;  %v217_v52 = vmul.f32 -0.5, %v763_v50  ;;  %v220_v54 = vand.u32 2147483647, %v763_v50 }
 0x12f   :  { %764 = vlog2.f32 %v214_v51  ;;  %v218_v53 = vadd.f32 1.0, %v217_v52  ;;  %vm221_vm4 = vcmp.lt.f32.partialorder %v220_v54, 0.0004427343 }
 0x131   :  { %v219_v57 = vmul.f32 %v763_v50, %v218_v53 }
 0x135   :  { %v765_v55 = vpop.eup %764 }
 0x136   :  { %v216_v56 = vmul.f32 0.6931472, %v765_v55 }
 0x138   :  { %v222_v59 = vsel %vm221_vm4, %v219_v57, %v216_v56  ;;  %vm167_vm4 = vcmp.ne.f32.partialorder %v959_v0, %v959_v0 }
 0x139   :  { %v286_v60 = vadd.f32 %v222_v59, %v158_v58 }
 0x13b   :  { %v294_v61 = vsel %vm166_vm5, %v118_v45, %v286_v60 }
 0x13c   :  { %338 = vmatmul.f32.vlgmr.msrb.gmra.mxu0 %v294_v61 }
 0x18f   :  { %v120_v1 = vpop.f32.mrf.mxu1 }
 0x190   :  { %v962_v2 = vadd.f32 %v120_v1, %v954_v43 }
 0x192   :  { %v184_v3 = vand.u32 2147483647, %v962_v2  ;;  %v160_v47 = vmax.f32 %v962_v2, 0.0  ;;  %vm168_vm7 = vcmp.ne.f32.partialorder %v962_v2, %v962_v2 }
 0x194   :  { %v192_v5 = vsub.f32 0.0, %v184_v3 }
 0x195   :  { %v149_v6 = vpop.f32.mrf.mxu2 }
 0x196   :  { %v202_v7 = vmul.f32 1.442695, %v192_v5  ;;  %v966_v8 = vadd.f32 %v149_v6, %v88_v62 }
 0x197   :  { %v123_v10 = vpop.f32.mrf.mxu1 }
 0x198   :  { %766 = vpow2.f32 %v202_v7  ;;  %v185_v11 = vand.u32 2147483647, %v966_v8  ;;  %v970_v12 = vadd.f32 %v123_v10, %v954_v43  ;;  %v161_v4 = vmax.f32 %v966_v8, 0.0 }
 0x199   :  { %vm169_vm10 = vcmp.ne.f32.partialorder %v966_v8, %v966_v8 }
 0x19a   :  { %v193_v13 = vsub.f32 0.0, %v185_v11  ;;  %v186_v14 = vand.u32 2147483647, %v970_v12  ;;  %v162_v11 = vmax.f32 %v970_v12, 0.0  ;;  %vm170_vm11 = vcmp.ne.f32.partialorder %v970_v12, %v970_v12 }
 0x19c   :  { %v204_v16 = vmul.f32 1.442695, %v193_v13  ;;  %v194_v17 = vsub.f32 0.0, %v186_v14 }
 0x19d   :  { %v152_v18 = vpop.f32.mrf.mxu2 }
 0x19e   :  { %v767_v19 = vpop.eup %766  ;;  %768 = vpow2.f32 %v204_v16  ;;  %v206_v20 = vmul.f32 1.442695, %v194_v17  ;;  %v973_v21 = vadd.f32 %v152_v18, %v88_v62 }
 0x19f   :  { %770 = vpow2.f32 %v200_v15  ;;  %v126_v22 = vpop.f32.mrf.mxu1  ;;  %v232_v23 = vadd.f32 1.0, %v767_v19  ;;  %v235_v24 = vmul.f32 -0.5, %v767_v19  ;;  %v238_v35 = vand.u32 2147483647, %v767_v19 }
 0x1a0   :  { %772 = vpow2.f32 %v206_v20  ;;  %v187_v25 = vand.u32 2147483647, %v973_v21  ;;  %v977_v26 = vadd.f32 %v126_v22, %v954_v43  ;;  %vm171_vm14 = vcmp.ne.f32.partialorder %v973_v21, %v973_v21 }
 0x1a1   :  { %774 = vlog2.f32 %v232_v23  ;;  %v236_v29 = vadd.f32 1.0, %v235_v24  ;;  %vm239_vm6 = vcmp.lt.f32.partialorder %v238_v35, 0.0004427343 }
 0x1a2   :  { %v195_v27 = vsub.f32 0.0, %v187_v25  ;;  %v188_v28 = vand.u32 2147483647, %v977_v26  ;;  %vm172_vm15 = vcmp.ne.f32.partialorder %v977_v26, %v977_v26 }
 0x1a3   :  { %v237_v42 = vmul.f32 %v767_v19, %v236_v29 }
 0x1a4   :  { %v769_v30 = vpop.eup %768  ;;  %v208_v31 = vmul.f32 1.442695, %v195_v27  ;;  %v196_v32 = vsub.f32 0.0, %v188_v28 }
 0x1a5   :  { %v980_v33 = vpop.eup %770  ;;  %v155_v34 = vpop.f32.mrf.mxu2  ;;  %v241_v36 = vadd.f32 1.0, %v769_v30  ;;  %v244_v40 = vmul.f32 -0.5, %v769_v30  ;;  %v247_v53 = vand.u32 2147483647, %v769_v30 }
 0x1a6   :  { %v773_v37 = vpop.eup %772  ;;  %776 = vpow2.f32 %v208_v31  ;;  %v210_v38 = vmul.f32 1.442695, %v196_v32  ;;  %v982_v39 = vadd.f32 %v155_v34, %v88_v62  ;;  %v223_v48 = vadd.f32 1.0, %v980_v33 }
 0x1a7   :  { %v775_v41 = vpop.eup %774  ;;  %778 = vlog2.f32 %v241_v36  ;;  %v250_v43 = vadd.f32 1.0, %v773_v37  ;;  %v253_v46 = vmul.f32 -0.5, %v773_v37  ;;  %v245_v51 = vadd.f32 1.0, %v244_v40 }
 0x1a8   :  { %780 = vpow2.f32 %v210_v38  ;;  %v189_v44 = vand.u32 2147483647, %v982_v39  ;;  %v234_v45 = vmul.f32 0.6931472, %v775_v41  ;;  %v256_v59 = vand.u32 2147483647, %v773_v37 }
 0x1a9   :  { %782 = vlog2.f32 %v250_v43  ;;  %v254_v56 = vadd.f32 1.0, %v253_v46  ;;  %v246_v63 = vmul.f32 %v769_v30, %v245_v51  ;;  %vm248_vm8 = vcmp.lt.f32.partialorder %v247_v53, 0.0004427343 }
 0x1aa   :  { %v197_v49 = vsub.f32 0.0, %v189_v44  ;;  %v240_v50 = vsel %vm239_vm6, %v237_v42, %v234_v45  ;;  %784 = vlog2.f32 %v223_v48  ;;  %vm257_vm9 = vcmp.lt.f32.partialorder %v256_v59, 0.0004427343 }
 0x1ab   :  { %v288_v52 = vadd.f32 %v240_v50, %v160_v47  ;;  %v255_v9 = vmul.f32 %v773_v37, %v254_v56  ;;  %v226_v22 = vmul.f32 -0.5, %v980_v33  ;;  %v163_v32 = vmax.f32 %v973_v21, 0.0 }
 0x1ac   :  { %v777_v54 = vpop.eup %776  ;;  %v212_v55 = vmul.f32 1.442695, %v197_v49  ;;  %v229_v34 = vand.u32 2147483647, %v980_v33  ;;  %v164_v41 = vmax.f32 %v977_v26, 0.0  ;;  %v159_v56 = vmax.f32 %v959_v0, 0.0 }
 0x1ad   :  { %v779_v57 = vpop.eup %778  ;;  %v296_v58 = vsel %vm168_vm7, %v962_v2, %v288_v52  ;;  %v259_v60 = vadd.f32 1.0, %v777_v54  ;;  %v262_v1 = vmul.f32 -0.5, %v777_v54  ;;  %v265_v18 = vand.u32 2147483647, %v777_v54 }
 0x1ae   :  { %v781_v61 = vpop.eup %780  ;;  %786 = vpow2.f32 %v212_v55  ;;  %341 = vmatmul.f32.gmra.mxu0 %v296_v58  ;;  %v243_v62 = vmul.f32 0.6931472, %v779_v57  ;;  %v227_v37 = vadd.f32 1.0, %v226_v22  ;;  %vm230_vm0 = vcmp.lt.f32.partialorder %v229_v34, 0.0004427343 }
 0x1af   :  { %v783_v3 = vpop.eup %782  ;;  %788 = vlog2.f32 %v259_v60  ;;  %v268_v5 = vadd.f32 1.0, %v781_v61  ;;  %v271_v10 = vmul.f32 -0.5, %v781_v61  ;;  %v263_v14 = vadd.f32 1.0, %v262_v1 }
 0x1b0   :  { %v249_v6 = vsel %vm248_vm8, %v246_v63, %v243_v62  ;;  %v252_v7 = vmul.f32 0.6931472, %v783_v3  ;;  %v785_v15 = vpop.eup %784  ;;  %v274_v25 = vand.u32 2147483647, %v781_v61  ;;  %vm266_vm12 = vcmp.lt.f32.partialorder %v265_v18, 0.0004427343 }
 0x1b1   :  { %v289_v2 = vadd.f32 %v249_v6, %v161_v4  ;;  %790 = vlog2.f32 %v268_v5  ;;  %v272_v20 = vadd.f32 1.0, %v271_v10  ;;  %v264_v29 = vmul.f32 %v777_v54, %v263_v14 }
 0x1b2   :  { %v258_v13 = vsel %vm257_vm9, %v255_v9, %v252_v7  ;;  %vm275_vm13 = vcmp.lt.f32.partialorder %v274_v25, 0.0004427343  ;;  %v225_v42 = vmul.f32 0.6931472, %v785_v15  ;;  %v228_v50 = vmul.f32 %v980_v33, %v227_v37 }
 0x1b3   :  { %v297_v16 = vsel %vm169_vm10, %v966_v8, %v289_v2  ;;  %v290_v17 = vadd.f32 %v258_v13, %v162_v11  ;;  %v1002_v8 = vld [vmem:[%s1324_s6] ss:$0 sm:$0xff]  ;;  %v273_v36 = vmul.f32 %v781_v61, %v272_v20  ;;  %vm173_vm2 = vcmp.ne.f32.partialorder %v982_v39, %v982_v39  ;;  %s829_s6 = smov 64  }
 0x1b4   :  { %v787_v19 = vpop.eup %786  ;;  %353 = vmatmul.f32.vlgmr.msra.gmra.mxu3 %v297_v16  ;;  %v231_v55 = vsel %vm230_vm0, %v228_v50, %v225_v42  ;;  %vm525_vm9 = vcmask 261248  }
 0x1b5   :  { %v789_v23 = vpop.eup %788  ;;  %v298_v24 = vsel %vm170_vm11, %v970_v12, %v290_v17  ;;  %v277_v27 = vadd.f32 1.0, %v787_v19  ;;  %v280_v30 = vmul.f32 -0.5, %v787_v19  ;;  %v283_v48 = vand.u32 2147483647, %v787_v19 }
 0x1b6   :  { %344 = vmatmul.f32.vlgmr.msrb.gmra.mxu1 %v298_v24  ;;  %v261_v28 = vmul.f32 0.6931472, %v789_v23  ;;  %v287_v59 = vadd.f32 %v231_v55, %v159_v56 }
 0x1b7   :  { %v791_v31 = vpop.eup %790  ;;  %792 = vlog2.f32 %v277_v27  ;;  %v281_v45 = vadd.f32 1.0, %v280_v30  ;;  %vm284_vm1 = vcmp.lt.f32.partialorder %v283_v48, 0.0004427343 }
 0x1b8   :  { %v267_v35 = vsel %vm266_vm12, %v264_v29, %v261_v28  ;;  %v270_v12 = vmul.f32 0.6931472, %v791_v31  ;;  %v295_v61 = vsel %vm167_vm4, %v959_v0, %v287_v59 }
 0x1b9   :  { %v339_v38 = vpop.f32.mrf.mxu0  ;;  %v291_v40 = vadd.f32 %v267_v35, %v163_v32  ;;  %v282_v54 = vmul.f32 %v787_v19, %v281_v45 }
 0x1ba   :  { %v340_v43 = vadd.f32 %v1002_v8, %v339_v38  ;;  %v276_v44 = vsel %vm275_vm13, %v273_v36, %v270_v12 }
 0x1bb   :  { %v299_v46 = vsel %vm171_vm14, %v973_v21, %v291_v40  ;;  %v292_v47 = vadd.f32 %v276_v44, %v164_v41  ;;  %v165_v21 = vmax.f32 %v982_v39, 0.0 }
 0x1bc   :  { %v693_v49 = vmul.f32 -1.442695, %v340_v43  ;;  %356 = vmatmul.f32.gmra.mxu3 %v299_v46 }
 0x1bd   :  { %v793_v51 = vpop.eup %792  ;;  %v300_v52 = vsel %vm172_vm15, %v977_v26, %v292_v47 }
 0x1be   :  { %794 = vpow2.f32 %v693_v49  ;;  %347 = vmatmul.f32.vlgmr.msrb.gmra.mxu2 %v300_v52  ;;  %v279_v53 = vmul.f32 0.6931472, %v793_v51 }
 0x1c0   :  { %v285_v57 = vsel %vm284_vm1, %v282_v54, %v279_v53 }
 0x1c1   :  { %v293_v58 = vadd.f32 %v285_v57, %v165_v21 }
 0x1c3   :  { %v301_v33 = vsel %vm173_vm2, %v982_v39, %v293_v58 }
 0x1c4   :  { %v795_v26 = vpop.eup %794  ;;  %359 = vmatmul.f32.gmra.mxu3 %v301_v33 }
 0x1c5   :  { %v387_v60 = vadd.f32 1.0, %v795_v26 }
 0x1c6   :  { %350 = vmatmul.f32.gmra.mxu2 %v295_v61 }
 0x1c7   :  { %796 = vrcp.f32 %v387_v60  ;;  %v406_v3 = vand.u32 2147483648, %v387_v60  ;;  %v404_v5 = vand.u32 2147483647, %v387_v60  ;;  %vm400_vm6 = vweird.f32 %v387_v60 }
 0x1c9   :  { %v407_v39 = vor.u32 1.1754944e-38, %v406_v3  ;;  %vm405_vm8 = vcmp.eq.f32.partialorder %v404_v5, 8.507059e+37 }
 0x1cd   :  { %v797_v62 = vpop.eup %796 }
 0x1ce   :  { %v396_v63 = vmul.f32 %v797_v62, %v387_v60  ;;  %vm401_vm5 = vweird.f32 %v797_v62 }
 0x1cf   :  { %vm402_vm7 = vmor %vm400_vm6, %vm401_vm5 }
 0x1d0   :  { %v397_v1 = vsub.f32 1.0, %v396_v63 }
 0x1d2   :  { %v398_v4 = vmul.f32 %v797_v62, %v397_v1 }
 0x1d4   :  { %v399_v6 = vadd.f32 %v797_v62, %v398_v4 }
 0x1d6   :  { %v403_v7 = vsel %vm402_vm7, %v797_v62, %v399_v6 }
 0x1d7   :  { %v408_v9 = vsel %vm405_vm8, %v407_v39, %v403_v7 }
 0x1d8   :  { %531 = vrot.lane.b32.xlu0 %v408_v9, %s829_s6  ;;  %521 = vrot.lane.b32.xlu2 %v408_v9, %s828_s13  ;;  %515 = vst.msk [vmem:[%s1325_s7] sm:$0xff] %vm91_vm3, %v408_v9 }
 0x1d9   :  { %517 = vrot.lane.b32.xlu1 %v408_v9, %s827_s3 }
 0x1e0   :  { %527 = vrot.lane.b32.xlu2 %v408_v9, %s826_s2 }
 0x22b   :  { %v342_v0 = vpop.f32.mrf.mxu0 }
 0x22c   :  { %v343_v10 = vadd.f32 %v1002_v8, %v342_v0 }
 0x22e   :  { %v694_v2 = vmul.f32 -1.442695, %v343_v10 }
 0x230   :  { %798 = vpow2.f32 %v694_v2 }
 0x232   :  { %v522_v11 = vpop.permute.xlu2 %521 }
 0x233   :  { %524 = vst.msk [vmem:[%s1325_s7 + $0x20] sm:$0xff] %vm91_vm3, %v522_v11  ;;  %v345_v13 = vpop.f32.mrf.mxu1 }
 0x234   :  { %526 = vst.msk [vmem:[%s1325_s7] sm:$0xff] %vm525_vm9, %v522_v11  ;;  %v346_v14 = vadd.f32 %v1002_v8, %v345_v13 }
 0x236   :  { %v799_v15 = vpop.eup %798  ;;  %v695_v16 = vmul.f32 -1.442695, %v346_v14 }
 0x237   :  { %v388_v17 = vadd.f32 1.0, %v799_v15  ;;  %v354_v18 = vpop.f32.mrf.mxu3 }
 0x238   :  { %800 = vpow2.f32 %v695_v16  ;;  %v355_v19 = vadd.f32 %v1002_v8, %v354_v18 }
 0x239   :  { %802 = vrcp.f32 %v388_v17  ;;  %v419_v12 = vand.u32 2147483647, %v388_v17  ;;  %v421_v36 = vand.u32 2147483648, %v388_v17  ;;  %vm415_vm11 = vweird.f32 %v388_v17 }
 0x23a   :  { %v698_v20 = vmul.f32 -1.442695, %v355_v19  ;;  %v528_v21 = vpop.permute.xlu2 %527 }
 0x23b   :  { %v422_v43 = vor.u32 1.1754944e-38, %v421_v36  ;;  %vm420_vm13 = vcmp.eq.f32.partialorder %v419_v12, 8.507059e+37 }
 0x23c   :  { %804 = vpow2.f32 %v698_v20 }
 0x23e   :  { %v801_v22 = vpop.eup %800 }
 0x23f   :  { %v803_v23 = vpop.eup %802  ;;  %v389_v24 = vadd.f32 1.0, %v801_v22  ;;  %v357_v25 = vpop.f32.mrf.mxu3 }
 0x240   :  { %v411_v27 = vmul.f32 %v803_v23, %v388_v17  ;;  %v358_v28 = vadd.f32 %v1002_v8, %v357_v25  ;;  %vm416_vm10 = vweird.f32 %v803_v23 }
 0x241   :  { %806 = vrcp.f32 %v389_v24  ;;  %v348_v29 = vpop.f32.mrf.mxu2  ;;  %vm417_vm12 = vmor %vm415_vm11, %vm416_vm10  ;;  %v436_v54 = vand.u32 2147483648, %v389_v24  ;;  %v434_v57 = vand.u32 2147483647, %v389_v24  ;;  %vm430_vm15 = vweird.f32 %v389_v24 }
 0x242   :  { %v805_v30 = vpop.eup %804  ;;  %v412_v31 = vsub.f32 1.0, %v411_v27  ;;  %v699_v32 = vmul.f32 -1.442695, %v358_v28  ;;  %v349_v34 = vadd.f32 %v1002_v8, %v348_v29 }
 0x243   :  { %v1044_v35 = vadd.f32 1.0, %v805_v30  ;;  %v437_v61 = vor.u32 1.1754944e-38, %v436_v54  ;;  %vm435_vm1 = vcmp.eq.f32.partialorder %v434_v57, 8.507059e+37 }
 0x244   :  { %808 = vpow2.f32 %v699_v32  ;;  %v696_v37 = vmul.f32 -1.442695, %v349_v34  ;;  %v413_v38 = vmul.f32 %v803_v23, %v412_v31 }
 0x245   :  { %810 = vrcp.f32 %v1044_v35  ;;  %v481_v39 = vand.u32 2147483648, %v1044_v35  ;;  %vm475_vm4 = vweird.f32 %v1044_v35 }
 0x246   :  { %v414_v40 = vadd.f32 %v803_v23, %v413_v38  ;;  %812 = vpow2.f32 %v696_v37 }
 0x247   :  { %v807_v41 = vpop.eup %806  ;;  %v360_v42 = vpop.f32.mrf.mxu3  ;;  %v482_v2 = vor.u32 1.1754944e-38, %v481_v39 }
 0x248   :  { %v426_v44 = vmul.f32 %v807_v41, %v389_v24  ;;  %v418_v45 = vsel %vm417_vm12, %v803_v23, %v414_v40  ;;  %v361_v46 = vadd.f32 %v1002_v8, %v360_v42  ;;  %vm431_vm14 = vweird.f32 %v807_v41 }
 0x249   :  { %v1048_v47 = vsel %vm420_vm13, %v422_v43, %v418_v45  ;;  %v351_v26 = vpop.f32.mrf.mxu2  ;;  %vm432_vm0 = vmor %vm430_vm15, %vm431_vm14 }
 0x24a   :  { %v809_v48 = vpop.eup %808  ;;  %v427_v49 = vsub.f32 1.0, %v426_v44  ;;  %v532_v50 = vpop.permute.xlu0 %531  ;;  %545 = vrot.lane.b32.xlu0 %v1048_v47, %s830_s30  ;;  %541 = vrot.lane.b32.xlu2 %v1048_v47, %s831_s8  ;;  %v700_v58 = vmul.f32 -1.442695, %v361_v46  ;;  %v352_v3 = vadd.f32 %v1002_v8, %v351_v26  ;;  %v479_v8 = vand.u32 2147483647, %v1044_v35 }
 0x24b   :  { %v811_v51 = vpop.eup %810  ;;  %v1054_v52 = vadd.f32 1.0, %v809_v48  ;;  %534 = vst.msk [vmem:[%s1325_s7 + $0x20] sm:$0xff] %vm525_vm9, %v532_v50  ;;  %v518_v53 = vpop.permute.xlu1 %517  ;;  %536 = vrot.lane.b32.xlu1 %v1048_v47, %s829_s6 }
 0x24c   :  { %v471_v55 = vmul.f32 %v811_v51, %v1044_v35  ;;  %520 = vst.msk [vmem:[%s1325_s7 + $0x10] sm:$0xff] %vm91_vm3, %v518_v53  ;;  %v428_v56 = vmul.f32 %v807_v41, %v427_v49  ;;  %v813_v59 = vpop.eup %812  ;;  %vm476_vm2 = vweird.f32 %v811_v51  ;;  %v697_v7 = vmul.f32 -1.442695, %v352_v3 }
 0x24d   :  { %814 = vrcp.f32 %v1054_v52  ;;  %530 = vst.msk [vmem:[%s1325_s7 + $0x10] sm:$0xff] %vm525_vm9, %v528_v21  ;;  %v1072_v1 = vadd.f32 1.0, %v813_v59  ;;  %vm477_vm5 = vmor %vm475_vm4, %vm476_vm2  ;;  %vm480_vm6 = vcmp.eq.f32.partialorder %v479_v8, 8.507059e+37  ;;  %v496_v23 = vand.u32 2147483648, %v1054_v52 }
 0x24e   :  { %v472_v33 = vsub.f32 1.0, %v471_v55  ;;  %v429_v60 = vadd.f32 %v807_v41, %v428_v56  ;;  %816 = vpow2.f32 %v700_v58  ;;  %vm490_vm8 = vweird.f32 %v1054_v52 }
 0x24f   :  { %818 = vrcp.f32 %v1072_v1  ;;  %v494_v25 = vand.u32 2147483647, %v1054_v52  ;;  %v497_v30 = vor.u32 1.1754944e-38, %v496_v23  ;;  %v451_v35 = vand.u32 2147483648, %v1072_v1 }
 0x250   :  { %v433_v62 = vsel %vm432_vm0, %v807_v41, %v429_v60  ;;  %v473_v63 = vmul.f32 %v811_v51, %v472_v33  ;;  %820 = vpow2.f32 %v697_v7  ;;  %vm445_vm13 = vweird.f32 %v1072_v1 }
 0x251   :  { %v438_v4 = vsel %vm435_vm1, %v437_v61, %v433_v62  ;;  %vm495_vm11 = vcmp.eq.f32.partialorder %v494_v25, 8.507059e+37  ;;  %v449_v36 = vand.u32 2147483647, %v1072_v1  ;;  %v452_v40 = vor.u32 1.1754944e-38, %v451_v35 }
 0x252   :  { %562 = vrot.lane.b32.xlu0 %v438_v4, %s828_s13  ;;  %556 = vst.msk [vmem:[%s1325_s7 + $0x8] sm:$0xff] %vm91_vm3, %v438_v4  ;;  %558 = vrot.lane.b32.xlu2 %v438_v4, %s827_s3  ;;  %v474_v5 = vadd.f32 %v811_v51, %v473_v63 }
 0x253   :  { %v815_v6 = vpop.eup %814  ;;  %551 = vrot.lane.b32.xlu1 %v1048_v47, %s832_s16  ;;  %vm450_vm15 = vcmp.eq.f32.partialorder %v449_v36, 8.507059e+37 }
 0x254   :  { %v486_v9 = vmul.f32 %v815_v6, %v1054_v52  ;;  %v478_v0 = vsel %vm477_vm5, %v811_v51, %v474_v5  ;;  %v817_v10 = vpop.eup %816  ;;  %vm491_vm7 = vweird.f32 %v815_v6 }
 0x255   :  { %v1088_v11 = vsel %vm480_vm6, %v482_v2, %v478_v0  ;;  %v394_v14 = vadd.f32 1.0, %v817_v10  ;;  %v819_v15 = vpop.eup %818  ;;  %vm492_vm10 = vmor %vm490_vm8, %vm491_vm7 }
 0x256   :  { %v487_v13 = vsub.f32 1.0, %v486_v9  ;;  %v441_v16 = vmul.f32 %v819_v15, %v1072_v1  ;;  %v821_v18 = vpop.eup %820  ;;  %vm446_vm12 = vweird.f32 %v819_v15 }
 0x257   :  { %822 = vrcp.f32 %v394_v14  ;;  %v391_v20 = vadd.f32 1.0, %v821_v18  ;;  %vm447_vm14 = vmor %vm445_vm13, %vm446_vm12  ;;  %v511_v45 = vand.u32 2147483648, %v394_v14  ;;  %vm505_vm1 = vweird.f32 %v394_v14 }
 0x258   :  { %v488_v17 = vmul.f32 %v815_v6, %v487_v13  ;;  %v442_v19 = vsub.f32 1.0, %v441_v16  ;;  %v509_v46 = vand.u32 2147483647, %v394_v14  ;;  %vm598_vm12 = vcmask 392448  }
 0x259   :  { %824 = vrcp.f32 %v391_v20  ;;  %v512_v50 = vor.u32 1.1754944e-38, %v511_v45  ;;  %v466_v53 = vand.u32 2147483648, %v391_v20  ;;  %vm460_vm6 = vweird.f32 %v391_v20 }
 0x25a   :  { %616 = vrot.lane.b32.xlu0 %v1088_v11, %s828_s13  ;;  %571 = vrot.lane.b32.xlu2 %v438_v4, %s829_s6  ;;  %v489_v22 = vadd.f32 %v815_v6, %v488_v17  ;;  %v443_v28 = vmul.f32 %v819_v15, %v442_v19  ;;  %vm510_vm4 = vcmp.eq.f32.partialorder %v509_v46, 8.507059e+37  ;;  %v464_v54 = vand.u32 2147483647, %v391_v20 }
 0x25b   :  { %567 = vrot.lane.b32.xlu1 %v438_v4, %s826_s2  ;;  %v467_v21 = vor.u32 1.1754944e-38, %v466_v53  ;;  %vm629_vm13 = vcmask 1048448  }
 0x25c   :  { %v493_v27 = vsel %vm492_vm10, %v815_v6, %v489_v22  ;;  %v444_v32 = vadd.f32 %v819_v15, %v443_v28  ;;  %vm465_vm8 = vcmp.eq.f32.partialorder %v464_v54, 8.507059e+37  ;;  %vm539_vm10 = vcmask 654848  }
 0x25d   :  { %v823_v24 = vpop.eup %822  ;;  %v1104_v31 = vsel %vm495_vm11, %v497_v30, %v493_v27  ;;  %vm549_vm11 = vcmask 786048  }
 0x25e   :  { %v501_v29 = vmul.f32 %v823_v24, %v394_v14  ;;  %v448_v37 = vsel %vm447_vm14, %v819_v15, %v444_v32  ;;  %vm506_vm0 = vweird.f32 %v823_v24 }
 0x25f   :  { %v825_v12 = vpop.eup %824  ;;  %v1115_v42 = vsel %vm450_vm15, %v452_v40, %v448_v37  ;;  %vm507_vm2 = vmor %vm505_vm1, %vm506_vm0 }
 0x260   :  { %v502_v34 = vsub.f32 1.0, %v501_v29  ;;  %v456_v38 = vmul.f32 %v825_v12, %v391_v20  ;;  %vm461_vm5 = vweird.f32 %v825_v12 }
 0x261   :  { %vm462_vm7 = vmor %vm460_vm6, %vm461_vm5 }
 0x262   :  { %631 = vrot.lane.b32.xlu0 %v1088_v11, %s831_s8  ;;  %625 = vrot.lane.b32.xlu2 %v1088_v11, %s829_s6  ;;  %v503_v41 = vmul.f32 %v823_v24, %v502_v34  ;;  %v457_v43 = vsub.f32 1.0, %v456_v38 }
 0x263   :  { %621 = vrot.lane.b32.xlu1 %v1088_v11, %s826_s2 }
 0x264   :  { %v504_v44 = vadd.f32 %v823_v24, %v503_v41  ;;  %v458_v49 = vmul.f32 %v825_v12, %v457_v43 }
 0x266   :  { %v508_v48 = vsel %vm507_vm2, %v823_v24, %v504_v44  ;;  %v459_v52 = vadd.f32 %v825_v12, %v458_v49 }
 0x267   :  { %v513_v51 = vsel %vm510_vm4, %v512_v50, %v508_v48 }
 0x268   :  { %v463_v55 = vsel %vm462_vm7, %v825_v12, %v459_v52 }
 0x269   :  { %v1130_v56 = vsel %vm465_vm8, %v467_v21, %v463_v55 }
 0x26a   :  { %644 = vrot.lane.b32.xlu0 %v1104_v31, %s832_s16  ;;  %640 = vrot.lane.b32.xlu2 %v1104_v31, %s830_s30 }
 0x26b   :  { %650 = vrot.lane.b32.xlu1 %v1104_v31, %s827_s3 }
 0x272   :  { %576 = vrot.lane.b32.xlu0 %v1115_v42, %s829_s6  ;;  %654 = vrot.lane.b32.xlu2 %v1104_v31, %s828_s13 }
 0x273   :  { %580 = vrot.lane.b32.xlu1 %v1115_v42, %s831_s8 }
 0x27a   :  { %589 = vrot.lane.b32.xlu0 %v1115_v42, %s832_s16  ;;  %584 = vrot.lane.b32.xlu2 %v1115_v42, %s830_s30 }
 0x27b   :  { %663 = vrot.lane.b32.xlu1 %v513_v51, %s826_s2 }
 0x282   :  { %659 = vrot.lane.b32.xlu0 %v513_v51, %s828_s13  ;;  %667 = vrot.lane.b32.xlu2 %v513_v51, %s829_s6 }
 0x283   :  { %595 = vrot.lane.b32.xlu1 %v1130_v56, %s830_s30 }
 0x28a   :  { %607 = vrot.lane.b32.xlu0 %v1130_v56, %s827_s3  ;;  %600 = vrot.lane.b32.xlu2 %v1130_v56, %s832_s16 }
 0x28b   :  { %611 = vrot.lane.b32.xlu1 %v1130_v56, %s828_s13 }
 0x292   :  { %676 = vrot.lane.b32.xlu0 %v513_v51, %s830_s30  ;;  %672 = vrot.lane.b32.xlu2 %v513_v51, %s831_s8 }
 0x293   :  { %635 = vrot.lane.b32.xlu1 %v1088_v11, %s830_s30 }
 0x2a4   :  { %v542_v57 = vpop.permute.xlu2 %541 }
 0x2a5   :  { %544 = vst.msk [vmem:[%s1325_s7 + $0x10] sm:$0xff] %vm539_vm10, %v542_v57 }
 0x2ac   :  { %v559_v58 = vpop.permute.xlu2 %558 }
 0x2ad   :  { %561 = vst.msk [vmem:[%s1325_s7 + $0x18] sm:$0xff] %vm91_vm3, %v559_v58 }
 0x2b4   :  { %v572_v59 = vpop.permute.xlu2 %571 }
 0x2bc   :  { %v546_v33 = vpop.permute.xlu0 %545  ;;  %v1152_v26 = vpop.permute.xlu2 %625 }
 0x2bd   :  { %548 = vst.msk [vmem:[%s1325_s7 + $0x20] sm:$0xff] %vm539_vm10, %v546_v33  ;;  %v537_v60 = vpop.permute.xlu1 %536 }
 0x2be   :  { %555 = vst.msk [vmem:[%s1325_s7 + $0x20] sm:$0xff] %vm549_vm11, %v1048_v47 }
 0x2bf   :  { %540 = vst.msk [vmem:[%s1325_s7] sm:$0xff] %vm539_vm10, %v537_v60 }
 0x2c0   :  { %550 = vst.msk [vmem:[%s1325_s7] sm:$0xff] %vm549_vm11, %v546_v33 }
 0x2c1   :  { %604 = vst.msk [vmem:[%s1325_s7 + $0x20] sm:$0xff] %vm598_vm12, %v1130_v56 }
 0x2c4   :  { %v563_v61 = vpop.permute.xlu0 %562  ;;  %v641_v62 = vpop.permute.xlu2 %640 }
 0x2c5   :  { %565 = vst.msk [vmem:[%s1325_s7 + $0x28] sm:$0xff] %vm91_vm3, %v563_v61  ;;  %v552_v47 = vpop.permute.xlu1 %551  ;;  %vm605_vm3 = vcmask 523648  }
 0x2c6   :  { %566 = vst.msk [vmem:[%s1325_s7 + $0x8] sm:$0xff] %vm525_vm9, %v563_v61 }
 0x2c7   :  { %574 = vst.msk [vmem:[%s1325_s7 + $0x28] sm:$0xff] %vm525_vm9, %v572_v59 }
 0x2c8   :  { %554 = vst.msk [vmem:[%s1325_s7 + $0x10] sm:$0xff] %vm549_vm11, %v552_v47 }
 0x2cc   :  { %v617_v63 = vpop.permute.xlu0 %616  ;;  %v655_v1 = vpop.permute.xlu2 %654 }
 0x2cd   :  { %v568_v3 = vpop.permute.xlu1 %567 }
 0x2ce   :  { %570 = vst.msk [vmem:[%s1325_s7 + $0x18] sm:$0xff] %vm525_vm9, %v568_v3  ;;  %vm619_vm9 = vcmask 917248  }
 0x2d4   :  { %v632_v4 = vpop.permute.xlu0 %631  ;;  %v585_v5 = vpop.permute.xlu2 %584 }
 0x2d5   :  { %587 = vst.msk [vmem:[%s1325_s7 + $0x28] sm:$0xff] %vm539_vm10, %v585_v5  ;;  %v622_v6 = vpop.permute.xlu1 %621 }
 0x2d6   :  { %593 = vst.msk [vmem:[%s1325_s7 + $0x28] sm:$0xff] %vm549_vm11, %v1115_v42 }
 0x2d7   :  { %648 = vst.msk [vmem:[%s1325_s7 + $0x28] sm:$0xff] %vm598_vm12, %v1104_v31 }
 0x2d8   :  { %657 = vst.msk [vmem:[%s1325_s7 + $0x28] sm:$0xff] %vm605_vm3, %v655_v1 }
 0x2dc   :  { %v645_v39 = vpop.permute.xlu0 %644  ;;  %v668_v8 = vpop.permute.xlu2 %667 }
 0x2dd   :  { %670 = vst.msk [vmem:[%s1325_s7 + $0x28] sm:$0xff] %vm619_vm9, %v668_v8  ;;  %v651_v7 = vpop.permute.xlu1 %650 }
 0x2e4   :  { %v577_v9 = vpop.permute.xlu0 %576  ;;  %v601_v0 = vpop.permute.xlu2 %600 }
 0x2e5   :  { %579 = vst.msk [vmem:[%s1325_s7 + $0x8] sm:$0xff] %vm539_vm10, %v577_v9  ;;  %v581_v10 = vpop.permute.xlu1 %580 }
 0x2e6   :  { %588 = vst.msk [vmem:[%s1325_s7 + $0x8] sm:$0xff] %vm549_vm11, %v585_v5 }
 0x2e7   :  { %643 = vst.msk [vmem:[%s1325_s7 + $0x8] sm:$0xff] %vm598_vm12, %v641_v62 }
 0x2e8   :  { %603 = vst.msk [vmem:[%s1325_s7 + $0x10] sm:$0xff] %vm598_vm12, %v601_v0 }
 0x2e9   :  { %649 = vst.msk [vmem:[%s1325_s7 + $0x8] sm:$0xff] %vm605_vm3, %v1104_v31 }
 0x2ea   :  { %583 = vst.msk [vmem:[%s1325_s7 + $0x18] sm:$0xff] %vm539_vm10, %v581_v10 }
 0x2ec   :  { %v590_v2 = vpop.permute.xlu0 %589  ;;  %v673_v13 = vpop.permute.xlu2 %672 }
 0x2ed   :  { %592 = vst.msk [vmem:[%s1325_s7 + $0x18] sm:$0xff] %vm549_vm11, %v590_v2  ;;  %v664_v11 = vpop.permute.xlu1 %663 }
 0x2ee   :  { %647 = vst.msk [vmem:[%s1325_s7 + $0x18] sm:$0xff] %vm598_vm12, %v645_v39 }
 0x2ef   :  { %653 = vst.msk [vmem:[%s1325_s7 + $0x18] sm:$0xff] %vm605_vm3, %v651_v7 }
 0x2f0   :  { %666 = vst.msk [vmem:[%s1325_s7 + $0x18] sm:$0xff] %vm619_vm9, %v664_v11 }
 0x2f1   :  { %675 = vst.msk [vmem:[%s1325_s7 + $0x18] sm:$0xff] %vm629_vm13, %v673_v13 }
 0x2f4   :  { %v660_v14 = vpop.permute.xlu0 %659 }
 0x2f5   :  { %662 = vst.msk [vmem:[%s1325_s7 + $0x8] sm:$0xff] %vm619_vm9, %v660_v14  ;;  %v596_v15 = vpop.permute.xlu1 %595 }
 0x2f6   :  { %671 = vst.msk [vmem:[%s1325_s7 + $0x8] sm:$0xff] %vm629_vm13, %v668_v8 }
 0x2f7   :  { %599 = vst.msk [vmem:[%s1325_s7] sm:$0xff] %vm598_vm12, %v596_v15 }
 0x2f8   :  { %606 = vst.msk [vmem:[%s1325_s7] sm:$0xff] %vm605_vm3, %v1130_v56 }
 0x2f9   :  { %620 = vst.msk [vmem:[%s1325_s7] sm:$0xff] %vm619_vm9, %v617_v63 }
 0x2fa   :  { %630 = vst.msk [vmem:[%s1325_s7] sm:$0xff] %vm629_vm13, %v1152_v26 }
 0x2fc   :  { %v608_v16 = vpop.permute.xlu0 %607 }
 0x2fd   :  { %610 = vst.msk [vmem:[%s1325_s7 + $0x10] sm:$0xff] %vm605_vm3, %v608_v16  ;;  %v612_v17 = vpop.permute.xlu1 %611 }
 0x2fe   :  { %624 = vst.msk [vmem:[%s1325_s7 + $0x10] sm:$0xff] %vm619_vm9, %v622_v6 }
 0x2ff   :  { %634 = vst.msk [vmem:[%s1325_s7 + $0x10] sm:$0xff] %vm629_vm13, %v632_v4 }
 0x300   :  { %614 = vst.msk [vmem:[%s1325_s7 + $0x20] sm:$0xff] %vm605_vm3, %v612_v17 }
 0x301   :  { %628 = vst.msk [vmem:[%s1325_s7 + $0x20] sm:$0xff] %vm619_vm9, %v1152_v26 }
 0x304   :  { %v677_v18 = vpop.permute.xlu0 %676 }
 0x305   :  { %679 = vst.msk [vmem:[%s1325_s7 + $0x28] sm:$0xff] %vm629_vm13, %v677_v18  ;;  %v636_v19 = vpop.permute.xlu1 %635 }
 0x306   :  { %638 = vst.msk [vmem:[%s1325_s7 + $0x20] sm:$0xff] %vm629_vm13, %v636_v19 }

</bundles_post_ra>
